<compile_context>
chip_gen: v6e
topology: v6e:2x2x1
jax: 0.10.0
libtpu: 0.0.40
codegen_flags: <defaults>
</compile_context>

<pallas_src>
import jax
import jax.numpy as jnp
from jax import lax
from jax.experimental import pallas as pl
from jax.experimental.pallas import tpu as pltpu


def gru_kernel(x_ref, wih_ref, whh_ref, bfold_ref, bhn_ref, out_ref, gi_ref):
    # x_ref    : (T*B, D)     bf16/f32  time-major rows: row index = t*B + b
    # wih_ref  : (D, 3*Hp)    bf16/f32  [W_ir | W_iz | W_in].T, gate-padded to Hp
    # whh_ref  : (Hp, 3*Hp)   bf16/f32  [W_hr | W_hz | W_hn].T, gate-padded
    # bfold_ref: (1, 3*Hp)    f32       [b_ir+b_hr | b_iz+b_hz | b_in], padded
    # bhn_ref  : (1, Hp)      f32       b_hn, padded
    # out_ref  : (B, Hp)      f32       h_T (padded hidden)
    # gi_ref   : (T*B, 3*Hp)  f32       scratch: hoisted input projection
    tb_rows, _ = x_ref.shape
    B, Hp = out_ref.shape
    T = tb_rows // B

    # --- Hoisted input projection: one big MXU op + one broadcast bias add. ---
    gi_ref[...] = (
        jnp.dot(x_ref[...], wih_ref[...], preferred_element_type=jnp.float32)
        + bfold_ref[...]
    )

    whh = whh_ref[...]                              # recurrent weights, resident
    b_hn = jnp.broadcast_to(bhn_ref[...], (B, Hp))  # hoisted broadcast

    def step(t, h):
        gi = gi_ref[pl.ds(t * B, B), :]                    # (B, 3*Hp), lane-aligned
        gh = jnp.dot(h.astype(whh.dtype), whh,
                     preferred_element_type=jnp.float32)   # (B, 3*Hp)
        r = jax.nn.sigmoid(gi[:, 0:Hp] + gh[:, 0:Hp])
        z = jax.nn.sigmoid(gi[:, Hp:2 * Hp] + gh[:, Hp:2 * Hp])
        n = jnp.tanh(gi[:, 2 * Hp:3 * Hp] + r * (gh[:, 2 * Hp:3 * Hp] + b_hn))
        return (1.0 - z) * n + z * h

    h0 = jnp.zeros((B, Hp), jnp.float32)
    h_last = lax.fori_loop(0, T, step, h0, unroll=True)
    out_ref[...] = h_last


def question_embedding_forward(x, w_ih, w_hh, b_ih, b_hh, *, mm_dtype=jnp.bfloat16):
    """GRU forward; returns output[:, -1] (== final hidden), shape (B, H)."""
    B, T, D = x.shape
    H = w_hh.shape[1]
    assert w_ih.shape == (3 * H, D)
    assert w_hh.shape == (3 * H, H)

    LANES = 128
    Hp = ((H + LANES - 1) // LANES) * LANES
    f32 = jnp.float32

    # Gate-padded, pre-transposed weights: columns [g*Hp, g*Hp+H) hold gate g
    # (PyTorch gate order r, z, n); padded rows/cols are zero so padded hidden
    # lanes stay exactly zero through the recurrence.
    wih_p = jnp.zeros((D, 3 * Hp), f32)
    whh_p = jnp.zeros((Hp, 3 * Hp), f32)
    bfold = jnp.zeros((1, 3 * Hp), f32)
    bhn = jnp.zeros((1, Hp), f32)
    for g in range(3):
        wih_p = wih_p.at[:, g * Hp:g * Hp + H].set(
            w_ih[g * H:(g + 1) * H, :].T.astype(f32))
        whh_p = whh_p.at[:H, g * Hp:g * Hp + H].set(
            w_hh[g * H:(g + 1) * H, :].T.astype(f32))
    # Fold b_ih (all gates) + b_hh (r, z gates) into the hoisted projection;
    # b_hn must stay inside r * (W_hn h + b_hn).
    bfold = bfold.at[0, 0 * Hp:0 * Hp + H].set((b_ih[0:H] + b_hh[0:H]).astype(f32))
    bfold = bfold.at[0, 1 * Hp:1 * Hp + H].set((b_ih[H:2 * H] + b_hh[H:2 * H]).astype(f32))
    bfold = bfold.at[0, 2 * Hp:2 * Hp + H].set(b_ih[2 * H:3 * H].astype(f32))
    bhn = bhn.at[0, :H].set(b_hh[2 * H:3 * H].astype(f32))

    # Time-major flatten of x (row index = t*B + b) so the hoisted projection is
    # a single 2-D matmul and per-step reads are contiguous row blocks.
    # NOTE: at toy sizes this transpose is negligible; at realistic sizes fuse it
    # into the projection or tile T with a BlockSpec instead of materializing it.
    x_flat = jnp.transpose(x, (1, 0, 2)).reshape(T * B, D).astype(mm_dtype)

    vmem = pl.BlockSpec(memory_space=pltpu.MemorySpace.VMEM)
    out_padded = pl.pallas_call(
        gru_kernel,
        out_shape=jax.ShapeDtypeStruct((B, Hp), jnp.float32),
        in_specs=[vmem, vmem, vmem, vmem, vmem],
        out_specs=vmem,
        scratch_shapes=[pltpu.VMEM((T * B, 3 * Hp), jnp.float32)],
    )(x_flat, wih_p.astype(mm_dtype), whh_p.astype(mm_dtype), bfold, bhn)

    return out_padded[:, :H]


def _ref_gru(x, w_ih, w_hh, b_ih, b_hh):
    """Pure-JAX f32 reference of the same GRU for sanity checking."""
    B, T, D = x.shape
    H = w_hh.shape[1]
    h = jnp.zeros((B, H), jnp.float32)
    for t in range(T):
        gi = x[:, t, :] @ w_ih.T + b_ih
        gh = h @ w_hh.T + b_hh
        i_r, i_z, i_n = gi[:, :H], gi[:, H:2 * H], gi[:, 2 * H:]
        h_r, h_z, h_n = gh[:, :H], gh[:, H:2 * H], gh[:, 2 * H:]
        r = jax.nn.sigmoid(i_r + h_r)
        z = jax.nn.sigmoid(i_z + h_z)
        n = jnp.tanh(i_n + r * h_n)
        h = (1.0 - z) * n + z * h
    return h


if __name__ == "__main__":
    # QuestionEmbedding(in_dim=16, num_hid=32, nlayers=1, bidirect=False, dropout=0.0, 'GRU')
    B, T, D, H = 2, 8, 16, 32

    key = jax.random.PRNGKey(0)
    kx, k1, k2, k3, k4 = jax.random.split(key, 5)
    bound = 1.0 / jnp.sqrt(H)  # PyTorch default GRU init: U(-1/sqrt(H), 1/sqrt(H))

    x = jax.random.normal(kx, (B, T, D), jnp.float32)
    w_ih = jax.random.uniform(k1, (3 * H, D), jnp.float32, -bound, bound)
    w_hh = jax.random.uniform(k2, (3 * H, H), jnp.float32, -bound, bound)
    b_ih = jax.random.uniform(k3, (3 * H,), jnp.float32, -bound, bound)
    b_hh = jax.random.uniform(k4, (3 * H,), jnp.float32, -bound, bound)

    out = question_embedding_forward(x, w_ih, w_hh, b_ih, b_hh)
    out = jax.block_until_ready(out)

    ref = _ref_gru(x, w_ih, w_hh, b_ih, b_hh)
    assert out.shape == (B, H)
    # bf16 MXU operands (f32 accumulation / gate math) -> loosened tolerance.
    assert jnp.allclose(out, ref, atol=3e-2, rtol=3e-2), "mismatch vs reference"

    print("KERNEL_OK")
</pallas_src>

<mosaic_0001>
module attributes {stable_mosaic.version = 11 : i64} {
  func.func @gru_kernel(%arg0: memref<16x16xbf16, #tpu.memory_space<vmem>>, %arg1: memref<16x384xbf16, #tpu.memory_space<vmem>>, %arg2: memref<128x384xbf16, #tpu.memory_space<vmem>>, %arg3: memref<1x384xf32, #tpu.memory_space<vmem>>, %arg4: memref<1x128xf32, #tpu.memory_space<vmem>>, %arg5: memref<2x128xf32, #tpu.memory_space<vmem>>, %arg6: memref<16x384xf32, #tpu.memory_space<vmem>>) attributes {dimension_semantics = [], scalar_prefetch = 0 : i64, scratch_operands = 1 : i64, tpu.core_type = #tpu.core_type<tc>} {
    %c0 = arith.constant 0 : index
    %c0_0 = arith.constant 0 : index
    %0 = vector.load %arg0[%c0, %c0_0] : memref<16x16xbf16, #tpu.memory_space<vmem>>, vector<16x16xbf16>
    %c0_1 = arith.constant 0 : index
    %c0_2 = arith.constant 0 : index
    %1 = vector.load %arg1[%c0_1, %c0_2] : memref<16x384xbf16, #tpu.memory_space<vmem>>, vector<16x384xbf16>
    %cst = arith.constant dense<0.000000e+00> : vector<16x384xf32>
    %2 = tpu.matmul %0, %1, %cst {dimension_numbers = #tpu.dot_dimension_numbers<[1], [0], [0], [1], [0, 0, 1, 1], [], []>} : vector<16x16xbf16>, vector<16x384xbf16>, vector<16x384xf32> -> vector<16x384xf32>
    %c0_3 = arith.constant 0 : index
    %c0_4 = arith.constant 0 : index
    %3 = vector.load %arg3[%c0_3, %c0_4] : memref<1x384xf32, #tpu.memory_space<vmem>>, vector<1x384xf32>
    %4 = vector.broadcast %3 : vector<1x384xf32> to vector<16x384xf32>
    %5 = arith.addf %2, %4 : vector<16x384xf32>
    %c0_5 = arith.constant 0 : index
    %c0_6 = arith.constant 0 : index
    %6 = vector.load %arg6[%c0_5, %c0_6] : memref<16x384xf32, #tpu.memory_space<vmem>>, vector<16x384xf32>
    tpu.vector_store %arg6[%c0_5, %c0_6], %5 {strides = array<i32>} : memref<16x384xf32, #tpu.memory_space<vmem>>, vector<16x384xf32>,
    %c0_7 = arith.constant 0 : index
    %c0_8 = arith.constant 0 : index
    %7 = vector.load %arg2[%c0_7, %c0_8] : memref<128x384xbf16, #tpu.memory_space<vmem>>, vector<128x384xbf16>
    %c0_9 = arith.constant 0 : index
    %c0_10 = arith.constant 0 : index
    %8 = vector.load %arg4[%c0_9, %c0_10] : memref<1x128xf32, #tpu.memory_space<vmem>>, vector<1x128xf32>
    %9 = vector.shape_cast %8 : vector<1x128xf32> to vector<1x128xf32>
    %10 = vector.broadcast %9 : vector<1x128xf32> to vector<2x128xf32>
    %cst_11 = arith.constant 0.000000e+00 : f32
    %11 = vector.broadcast %cst_11 : f32 to vector<2x128xf32>
    %c0_i32 = arith.constant 0 : i32
    %c2_i32 = arith.constant 2 : i32
    %12 = arith.muli %c0_i32, %c2_i32 : i32
    %13 = arith.index_cast %12 : i32 to index
    %c0_12 = arith.constant 0 : index
    %14 = vector.load %arg6[%13, %c0_12] : memref<16x384xf32, #tpu.memory_space<vmem>>, vector<2x384xf32>
    %15 = arith.truncf %11 : vector<2x128xf32> to vector<2x128xbf16>
    %cst_13 = arith.constant dense<0.000000e+00> : vector<2x384xf32>
    %16 = tpu.matmul %15, %7, %cst_13 {dimension_numbers = #tpu.dot_dimension_numbers<[1], [0], [0], [1], [0, 0, 1, 1], [], []>} : vector<2x128xbf16>, vector<128x384xbf16>, vector<2x384xf32> -> vector<2x384xf32>
    %17 = vector.extract_strided_slice %14 {offsets = [0, 0], sizes = [2, 128], strides = [1, 1]} : vector<2x384xf32> to vector<2x128xf32>
    %18 = vector.extract_strided_slice %16 {offsets = [0, 0], sizes = [2, 128], strides = [1, 1]} : vector<2x384xf32> to vector<2x128xf32>
    %19 = arith.addf %17, %18 : vector<2x128xf32>
    %20 = arith.negf %19 : vector<2x128xf32>
    %21 = math.exp %20 : vector<2x128xf32>
    %cst_14 = arith.constant 1.000000e+00 : f32
    %22 = vector.broadcast %cst_14 : f32 to vector<2x128xf32>
    %23 = arith.addf %22, %21 : vector<2x128xf32>
    %24 = arith.divf %22, %23 : vector<2x128xf32>
    %25 = vector.extract_strided_slice %14 {offsets = [0, 128], sizes = [2, 128], strides = [1, 1]} : vector<2x384xf32> to vector<2x128xf32>
    %26 = vector.extract_strided_slice %16 {offsets = [0, 128], sizes = [2, 128], strides = [1, 1]} : vector<2x384xf32> to vector<2x128xf32>
    %27 = arith.addf %25, %26 : vector<2x128xf32>
    %28 = arith.negf %27 : vector<2x128xf32>
    %29 = math.exp %28 : vector<2x128xf32>
    %cst_15 = arith.constant 1.000000e+00 : f32
    %30 = vector.broadcast %cst_15 : f32 to vector<2x128xf32>
    %31 = arith.addf %30, %29 : vector<2x128xf32>
    %32 = arith.divf %30, %31 : vector<2x128xf32>
    %33 = vector.extract_strided_slice %14 {offsets = [0, 256], sizes = [2, 128], strides = [1, 1]} : vector<2x384xf32> to vector<2x128xf32>
    %34 = vector.extract_strided_slice %16 {offsets = [0, 256], sizes = [2, 128], strides = [1, 1]} : vector<2x384xf32> to vector<2x128xf32>
    %35 = arith.addf %34, %10 : vector<2x128xf32>
    %36 = arith.mulf %24, %35 : vector<2x128xf32>
    %37 = arith.addf %33, %36 : vector<2x128xf32>
    %38 = math.tanh %37 : vector<2x128xf32>
    %cst_16 = arith.constant 1.000000e+00 : f32
    %39 = vector.broadcast %cst_16 : f32 to vector<2x128xf32>
    %40 = arith.subf %39, %32 : vector<2x128xf32>
    %41 = arith.mulf %40, %38 : vector<2x128xf32>
    %42 = arith.mulf %32, %11 : vector<2x128xf32>
    %43 = arith.addf %41, %42 : vector<2x128xf32>
    %c1_i32 = arith.constant 1 : i32
    %c2_i32_17 = arith.constant 2 : i32
    %44 = arith.muli %c1_i32, %c2_i32_17 : i32
    %45 = arith.index_cast %44 : i32 to index
    %c0_18 = arith.constant 0 : index
    %46 = vector.load %arg6[%45, %c0_18] : memref<16x384xf32, #tpu.memory_space<vmem>>, vector<2x384xf32>
    %47 = arith.truncf %43 : vector<2x128xf32> to vector<2x128xbf16>
    %cst_19 = arith.constant dense<0.000000e+00> : vector<2x384xf32>
    %48 = tpu.matmul %47, %7, %cst_19 {dimension_numbers = #tpu.dot_dimension_numbers<[1], [0], [0], [1], [0, 0, 1, 1], [], []>} : vector<2x128xbf16>, vector<128x384xbf16>, vector<2x384xf32> -> vector<2x384xf32>
    %49 = vector.extract_strided_slice %46 {offsets = [0, 0], sizes = [2, 128], strides = [1, 1]} : vector<2x384xf32> to vector<2x128xf32>
    %50 = vector.extract_strided_slice %48 {offsets = [0, 0], sizes = [2, 128], strides = [1, 1]} : vector<2x384xf32> to vector<2x128xf32>
    %51 = arith.addf %49, %50 : vector<2x128xf32>
    %52 = arith.negf %51 : vector<2x128xf32>
    %53 = math.exp %52 : vector<2x128xf32>
    %cst_20 = arith.constant 1.000000e+00 : f32
    %54 = vector.broadcast %cst_20 : f32 to vector<2x128xf32>
    %55 = arith.addf %54, %53 : vector<2x128xf32>
    %56 = arith.divf %54, %55 : vector<2x128xf32>
    %57 = vector.extract_strided_slice %46 {offsets = [0, 128], sizes = [2, 128], strides = [1, 1]} : vector<2x384xf32> to vector<2x128xf32>
    %58 = vector.extract_strided_slice %48 {offsets = [0, 128], sizes = [2, 128], strides = [1, 1]} : vector<2x384xf32> to vector<2x128xf32>
    %59 = arith.addf %57, %58 : vector<2x128xf32>
    %60 = arith.negf %59 : vector<2x128xf32>
    %61 = math.exp %60 : vector<2x128xf32>
    %cst_21 = arith.constant 1.000000e+00 : f32
    %62 = vector.broadcast %cst_21 : f32 to vector<2x128xf32>
    %63 = arith.addf %62, %61 : vector<2x128xf32>
    %64 = arith.divf %62, %63 : vector<2x128xf32>
    %65 = vector.extract_strided_slice %46 {offsets = [0, 256], sizes = [2, 128], strides = [1, 1]} : vector<2x384xf32> to vector<2x128xf32>
    %66 = vector.extract_strided_slice %48 {offsets = [0, 256], sizes = [2, 128], strides = [1, 1]} : vector<2x384xf32> to vector<2x128xf32>
    %67 = arith.addf %66, %10 : vector<2x128xf32>
    %68 = arith.mulf %56, %67 : vector<2x128xf32>
    %69 = arith.addf %65, %68 : vector<2x128xf32>
    %70 = math.tanh %69 : vector<2x128xf32>
    %cst_22 = arith.constant 1.000000e+00 : f32
    %71 = vector.broadcast %cst_22 : f32 to vector<2x128xf32>
    %72 = arith.subf %71, %64 : vector<2x128xf32>
    %73 = arith.mulf %72, %70 : vector<2x128xf32>
    %74 = arith.mulf %64, %43 : vector<2x128xf32>
    %75 = arith.addf %73, %74 : vector<2x128xf32>
    %c2_i32_23 = arith.constant 2 : i32
    %c2_i32_24 = arith.constant 2 : i32
    %76 = arith.muli %c2_i32_23, %c2_i32_24 : i32
    %77 = arith.index_cast %76 : i32 to index
    %c0_25 = arith.constant 0 : index
    %78 = vector.load %arg6[%77, %c0_25] : memref<16x384xf32, #tpu.memory_space<vmem>>, vector<2x384xf32>
    %79 = arith.truncf %75 : vector<2x128xf32> to vector<2x128xbf16>
    %cst_26 = arith.constant dense<0.000000e+00> : vector<2x384xf32>
    %80 = tpu.matmul %79, %7, %cst_26 {dimension_numbers = #tpu.dot_dimension_numbers<[1], [0], [0], [1], [0, 0, 1, 1], [], []>} : vector<2x128xbf16>, vector<128x384xbf16>, vector<2x384xf32> -> vector<2x384xf32>
    %81 = vector.extract_strided_slice %78 {offsets = [0, 0], sizes = [2, 128], strides = [1, 1]} : vector<2x384xf32> to vector<2x128xf32>
    %82 = vector.extract_strided_slice %80 {offsets = [0, 0], sizes = [2, 128], strides = [1, 1]} : vector<2x384xf32> to vector<2x128xf32>
    %83 = arith.addf %81, %82 : vector<2x128xf32>
    %84 = arith.negf %83 : vector<2x128xf32>
    %85 = math.exp %84 : vector<2x128xf32>
    %cst_27 = arith.constant 1.000000e+00 : f32
    %86 = vector.broadcast %cst_27 : f32 to vector<2x128xf32>
    %87 = arith.addf %86, %85 : vector<2x128xf32>
    %88 = arith.divf %86, %87 : vector<2x128xf32>
    %89 = vector.extract_strided_slice %78 {offsets = [0, 128], sizes = [2, 128], strides = [1, 1]} : vector<2x384xf32> to vector<2x128xf32>
    %90 = vector.extract_strided_slice %80 {offsets = [0, 128], sizes = [2, 128], strides = [1, 1]} : vector<2x384xf32> to vector<2x128xf32>
    %91 = arith.addf %89, %90 : vector<2x128xf32>
    %92 = arith.negf %91 : vector<2x128xf32>
    %93 = math.exp %92 : vector<2x128xf32>
    %cst_28 = arith.constant 1.000000e+00 : f32
    %94 = vector.broadcast %cst_28 : f32 to vector<2x128xf32>
    %95 = arith.addf %94, %93 : vector<2x128xf32>
    %96 = arith.divf %94, %95 : vector<2x128xf32>
    %97 = vector.extract_strided_slice %78 {offsets = [0, 256], sizes = [2, 128], strides = [1, 1]} : vector<2x384xf32> to vector<2x128xf32>
    %98 = vector.extract_strided_slice %80 {offsets = [0, 256], sizes = [2, 128], strides = [1, 1]} : vector<2x384xf32> to vector<2x128xf32>
    %99 = arith.addf %98, %10 : vector<2x128xf32>
    %100 = arith.mulf %88, %99 : vector<2x128xf32>
    %101 = arith.addf %97, %100 : vector<2x128xf32>
    %102 = math.tanh %101 : vector<2x128xf32>
    %cst_29 = arith.constant 1.000000e+00 : f32
    %103 = vector.broadcast %cst_29 : f32 to vector<2x128xf32>
    %104 = arith.subf %103, %96 : vector<2x128xf32>
    %105 = arith.mulf %104, %102 : vector<2x128xf32>
    %106 = arith.mulf %96, %75 : vector<2x128xf32>
    %107 = arith.addf %105, %106 : vector<2x128xf32>
    %c3_i32 = arith.constant 3 : i32
    %c2_i32_30 = arith.constant 2 : i32
    %108 = arith.muli %c3_i32, %c2_i32_30 : i32
    %109 = arith.index_cast %108 : i32 to index
    %c0_31 = arith.constant 0 : index
    %110 = vector.load %arg6[%109, %c0_31] : memref<16x384xf32, #tpu.memory_space<vmem>>, vector<2x384xf32>
    %111 = arith.truncf %107 : vector<2x128xf32> to vector<2x128xbf16>
    %cst_32 = arith.constant dense<0.000000e+00> : vector<2x384xf32>
    %112 = tpu.matmul %111, %7, %cst_32 {dimension_numbers = #tpu.dot_dimension_numbers<[1], [0], [0], [1], [0, 0, 1, 1], [], []>} : vector<2x128xbf16>, vector<128x384xbf16>, vector<2x384xf32> -> vector<2x384xf32>
    %113 = vector.extract_strided_slice %110 {offsets = [0, 0], sizes = [2, 128], strides = [1, 1]} : vector<2x384xf32> to vector<2x128xf32>
    %114 = vector.extract_strided_slice %112 {offsets = [0, 0], sizes = [2, 128], strides = [1, 1]} : vector<2x384xf32> to vector<2x128xf32>
    %115 = arith.addf %113, %114 : vector<2x128xf32>
    %116 = arith.negf %115 : vector<2x128xf32>
    %117 = math.exp %116 : vector<2x128xf32>
    %cst_33 = arith.constant 1.000000e+00 : f32
    %118 = vector.broadcast %cst_33 : f32 to vector<2x128xf32>
    %119 = arith.addf %118, %117 : vector<2x128xf32>
    %120 = arith.divf %118, %119 : vector<2x128xf32>
    %121 = vector.extract_strided_slice %110 {offsets = [0, 128], sizes = [2, 128], strides = [1, 1]} : vector<2x384xf32> to vector<2x128xf32>
    %122 = vector.extract_strided_slice %112 {offsets = [0, 128], sizes = [2, 128], strides = [1, 1]} : vector<2x384xf32> to vector<2x128xf32>
    %123 = arith.addf %121, %122 : vector<2x128xf32>
    %124 = arith.negf %123 : vector<2x128xf32>
    %125 = math.exp %124 : vector<2x128xf32>
    %cst_34 = arith.constant 1.000000e+00 : f32
    %126 = vector.broadcast %cst_34 : f32 to vector<2x128xf32>
    %127 = arith.addf %126, %125 : vector<2x128xf32>
    %128 = arith.divf %126, %127 : vector<2x128xf32>
    %129 = vector.extract_strided_slice %110 {offsets = [0, 256], sizes = [2, 128], strides = [1, 1]} : vector<2x384xf32> to vector<2x128xf32>
    %130 = vector.extract_strided_slice %112 {offsets = [0, 256], sizes = [2, 128], strides = [1, 1]} : vector<2x384xf32> to vector<2x128xf32>
    %131 = arith.addf %130, %10 : vector<2x128xf32>
    %132 = arith.mulf %120, %131 : vector<2x128xf32>
    %133 = arith.addf %129, %132 : vector<2x128xf32>
    %134 = math.tanh %133 : vector<2x128xf32>
    %cst_35 = arith.constant 1.000000e+00 : f32
    %135 = vector.broadcast %cst_35 : f32 to vector<2x128xf32>
    %136 = arith.subf %135, %128 : vector<2x128xf32>
    %137 = arith.mulf %136, %134 : vector<2x128xf32>
    %138 = arith.mulf %128, %107 : vector<2x128xf32>
    %139 = arith.addf %137, %138 : vector<2x128xf32>
    %c4_i32 = arith.constant 4 : i32
    %c2_i32_36 = arith.constant 2 : i32
    %140 = arith.muli %c4_i32, %c2_i32_36 : i32
    %141 = arith.index_cast %140 : i32 to index
    %c0_37 = arith.constant 0 : index
    %142 = vector.load %arg6[%141, %c0_37] : memref<16x384xf32, #tpu.memory_space<vmem>>, vector<2x384xf32>
    %143 = arith.truncf %139 : vector<2x128xf32> to vector<2x128xbf16>
    %cst_38 = arith.constant dense<0.000000e+00> : vector<2x384xf32>
    %144 = tpu.matmul %143, %7, %cst_38 {dimension_numbers = #tpu.dot_dimension_numbers<[1], [0], [0], [1], [0, 0, 1, 1], [], []>} : vector<2x128xbf16>, vector<128x384xbf16>, vector<2x384xf32> -> vector<2x384xf32>
    %145 = vector.extract_strided_slice %142 {offsets = [0, 0], sizes = [2, 128], strides = [1, 1]} : vector<2x384xf32> to vector<2x128xf32>
    %146 = vector.extract_strided_slice %144 {offsets = [0, 0], sizes = [2, 128], strides = [1, 1]} : vector<2x384xf32> to vector<2x128xf32>
    %147 = arith.addf %145, %146 : vector<2x128xf32>
    %148 = arith.negf %147 : vector<2x128xf32>
    %149 = math.exp %148 : vector<2x128xf32>
    %cst_39 = arith.constant 1.000000e+00 : f32
    %150 = vector.broadcast %cst_39 : f32 to vector<2x128xf32>
    %151 = arith.addf %150, %149 : vector<2x128xf32>
    %152 = arith.divf %150, %151 : vector<2x128xf32>
    %153 = vector.extract_strided_slice %142 {offsets = [0, 128], sizes = [2, 128], strides = [1, 1]} : vector<2x384xf32> to vector<2x128xf32>
    %154 = vector.extract_strided_slice %144 {offsets = [0, 128], sizes = [2, 128], strides = [1, 1]} : vector<2x384xf32> to vector<2x128xf32>
    %155 = arith.addf %153, %154 : vector<2x128xf32>
    %156 = arith.negf %155 : vector<2x128xf32>
    %157 = math.exp %156 : vector<2x128xf32>
    %cst_40 = arith.constant 1.000000e+00 : f32
    %158 = vector.broadcast %cst_40 : f32 to vector<2x128xf32>
    %159 = arith.addf %158, %157 : vector<2x128xf32>
    %160 = arith.divf %158, %159 : vector<2x128xf32>
    %161 = vector.extract_strided_slice %142 {offsets = [0, 256], sizes = [2, 128], strides = [1, 1]} : vector<2x384xf32> to vector<2x128xf32>
    %162 = vector.extract_strided_slice %144 {offsets = [0, 256], sizes = [2, 128], strides = [1, 1]} : vector<2x384xf32> to vector<2x128xf32>
    %163 = arith.addf %162, %10 : vector<2x128xf32>
    %164 = arith.mulf %152, %163 : vector<2x128xf32>
    %165 = arith.addf %161, %164 : vector<2x128xf32>
    %166 = math.tanh %165 : vector<2x128xf32>
    %cst_41 = arith.constant 1.000000e+00 : f32
    %167 = vector.broadcast %cst_41 : f32 to vector<2x128xf32>
    %168 = arith.subf %167, %160 : vector<2x128xf32>
    %169 = arith.mulf %168, %166 : vector<2x128xf32>
    %170 = arith.mulf %160, %139 : vector<2x128xf32>
    %171 = arith.addf %169, %170 : vector<2x128xf32>
    %c5_i32 = arith.constant 5 : i32
    %c2_i32_42 = arith.constant 2 : i32
    %172 = arith.muli %c5_i32, %c2_i32_42 : i32
    %173 = arith.index_cast %172 : i32 to index
    %c0_43 = arith.constant 0 : index
    %174 = vector.load %arg6[%173, %c0_43] : memref<16x384xf32, #tpu.memory_space<vmem>>, vector<2x384xf32>
    %175 = arith.truncf %171 : vector<2x128xf32> to vector<2x128xbf16>
    %cst_44 = arith.constant dense<0.000000e+00> : vector<2x384xf32>
    %176 = tpu.matmul %175, %7, %cst_44 {dimension_numbers = #tpu.dot_dimension_numbers<[1], [0], [0], [1], [0, 0, 1, 1], [], []>} : vector<2x128xbf16>, vector<128x384xbf16>, vector<2x384xf32> -> vector<2x384xf32>
    %177 = vector.extract_strided_slice %174 {offsets = [0, 0], sizes = [2, 128], strides = [1, 1]} : vector<2x384xf32> to vector<2x128xf32>
    %178 = vector.extract_strided_slice %176 {offsets = [0, 0], sizes = [2, 128], strides = [1, 1]} : vector<2x384xf32> to vector<2x128xf32>
    %179 = arith.addf %177, %178 : vector<2x128xf32>
    %180 = arith.negf %179 : vector<2x128xf32>
    %181 = math.exp %180 : vector<2x128xf32>
    %cst_45 = arith.constant 1.000000e+00 : f32
    %182 = vector.broadcast %cst_45 : f32 to vector<2x128xf32>
    %183 = arith.addf %182, %181 : vector<2x128xf32>
    %184 = arith.divf %182, %183 : vector<2x128xf32>
    %185 = vector.extract_strided_slice %174 {offsets = [0, 128], sizes = [2, 128], strides = [1, 1]} : vector<2x384xf32> to vector<2x128xf32>
    %186 = vector.extract_strided_slice %176 {offsets = [0, 128], sizes = [2, 128], strides = [1, 1]} : vector<2x384xf32> to vector<2x128xf32>
    %187 = arith.addf %185, %186 : vector<2x128xf32>
    %188 = arith.negf %187 : vector<2x128xf32>
    %189 = math.exp %188 : vector<2x128xf32>
    %cst_46 = arith.constant 1.000000e+00 : f32
    %190 = vector.broadcast %cst_46 : f32 to vector<2x128xf32>
    %191 = arith.addf %190, %189 : vector<2x128xf32>
    %192 = arith.divf %190, %191 : vector<2x128xf32>
    %193 = vector.extract_strided_slice %174 {offsets = [0, 256], sizes = [2, 128], strides = [1, 1]} : vector<2x384xf32> to vector<2x128xf32>
    %194 = vector.extract_strided_slice %176 {offsets = [0, 256], sizes = [2, 128], strides = [1, 1]} : vector<2x384xf32> to vector<2x128xf32>
    %195 = arith.addf %194, %10 : vector<2x128xf32>
    %196 = arith.mulf %184, %195 : vector<2x128xf32>
    %197 = arith.addf %193, %196 : vector<2x128xf32>
    %198 = math.tanh %197 : vector<2x128xf32>
    %cst_47 = arith.constant 1.000000e+00 : f32
    %199 = vector.broadcast %cst_47 : f32 to vector<2x128xf32>
    %200 = arith.subf %199, %192 : vector<2x128xf32>
    %201 = arith.mulf %200, %198 : vector<2x128xf32>
    %202 = arith.mulf %192, %171 : vector<2x128xf32>
    %203 = arith.addf %201, %202 : vector<2x128xf32>
    %c6_i32 = arith.constant 6 : i32
    %c2_i32_48 = arith.constant 2 : i32
    %204 = arith.muli %c6_i32, %c2_i32_48 : i32
    %205 = arith.index_cast %204 : i32 to index
    %c0_49 = arith.constant 0 : index
    %206 = vector.load %arg6[%205, %c0_49] : memref<16x384xf32, #tpu.memory_space<vmem>>, vector<2x384xf32>
    %207 = arith.truncf %203 : vector<2x128xf32> to vector<2x128xbf16>
    %cst_50 = arith.constant dense<0.000000e+00> : vector<2x384xf32>
    %208 = tpu.matmul %207, %7, %cst_50 {dimension_numbers = #tpu.dot_dimension_numbers<[1], [0], [0], [1], [0, 0, 1, 1], [], []>} : vector<2x128xbf16>, vector<128x384xbf16>, vector<2x384xf32> -> vector<2x384xf32>
    %209 = vector.extract_strided_slice %206 {offsets = [0, 0], sizes = [2, 128], strides = [1, 1]} : vector<2x384xf32> to vector<2x128xf32>
    %210 = vector.extract_strided_slice %208 {offsets = [0, 0], sizes = [2, 128], strides = [1, 1]} : vector<2x384xf32> to vector<2x128xf32>
    %211 = arith.addf %209, %210 : vector<2x128xf32>
    %212 = arith.negf %211 : vector<2x128xf32>
    %213 = math.exp %212 : vector<2x128xf32>
    %cst_51 = arith.constant 1.000000e+00 : f32
    %214 = vector.broadcast %cst_51 : f32 to vector<2x128xf32>
    %215 = arith.addf %214, %213 : vector<2x128xf32>
    %216 = arith.divf %214, %215 : vector<2x128xf32>
    %217 = vector.extract_strided_slice %206 {offsets = [0, 128], sizes = [2, 128], strides = [1, 1]} : vector<2x384xf32> to vector<2x128xf32>
    %218 = vector.extract_strided_slice %208 {offsets = [0, 128], sizes = [2, 128], strides = [1, 1]} : vector<2x384xf32> to vector<2x128xf32>
    %219 = arith.addf %217, %218 : vector<2x128xf32>
    %220 = arith.negf %219 : vector<2x128xf32>
    %221 = math.exp %220 : vector<2x128xf32>
    %cst_52 = arith.constant 1.000000e+00 : f32
    %222 = vector.broadcast %cst_52 : f32 to vector<2x128xf32>
    %223 = arith.addf %222, %221 : vector<2x128xf32>
    %224 = arith.divf %222, %223 : vector<2x128xf32>
    %225 = vector.extract_strided_slice %206 {offsets = [0, 256], sizes = [2, 128], strides = [1, 1]} : vector<2x384xf32> to vector<2x128xf32>
    %226 = vector.extract_strided_slice %208 {offsets = [0, 256], sizes = [2, 128], strides = [1, 1]} : vector<2x384xf32> to vector<2x128xf32>
    %227 = arith.addf %226, %10 : vector<2x128xf32>
    %228 = arith.mulf %216, %227 : vector<2x128xf32>
    %229 = arith.addf %225, %228 : vector<2x128xf32>
    %230 = math.tanh %229 : vector<2x128xf32>
    %cst_53 = arith.constant 1.000000e+00 : f32
    %231 = vector.broadcast %cst_53 : f32 to vector<2x128xf32>
    %232 = arith.subf %231, %224 : vector<2x128xf32>
    %233 = arith.mulf %232, %230 : vector<2x128xf32>
    %234 = arith.mulf %224, %203 : vector<2x128xf32>
    %235 = arith.addf %233, %234 : vector<2x128xf32>
    %c7_i32 = arith.constant 7 : i32
    %c2_i32_54 = arith.constant 2 : i32
    %236 = arith.muli %c7_i32, %c2_i32_54 : i32
    %237 = arith.index_cast %236 : i32 to index
    %c0_55 = arith.constant 0 : index
    %238 = vector.load %arg6[%237, %c0_55] : memref<16x384xf32, #tpu.memory_space<vmem>>, vector<2x384xf32>
    %239 = arith.truncf %235 : vector<2x128xf32> to vector<2x128xbf16>
    %cst_56 = arith.constant dense<0.000000e+00> : vector<2x384xf32>
    %240 = tpu.matmul %239, %7, %cst_56 {dimension_numbers = #tpu.dot_dimension_numbers<[1], [0], [0], [1], [0, 0, 1, 1], [], []>} : vector<2x128xbf16>, vector<128x384xbf16>, vector<2x384xf32> -> vector<2x384xf32>
    %241 = vector.extract_strided_slice %238 {offsets = [0, 0], sizes = [2, 128], strides = [1, 1]} : vector<2x384xf32> to vector<2x128xf32>
    %242 = vector.extract_strided_slice %240 {offsets = [0, 0], sizes = [2, 128], strides = [1, 1]} : vector<2x384xf32> to vector<2x128xf32>
    %243 = arith.addf %241, %242 : vector<2x128xf32>
    %244 = arith.negf %243 : vector<2x128xf32>
    %245 = math.exp %244 : vector<2x128xf32>
    %cst_57 = arith.constant 1.000000e+00 : f32
    %246 = vector.broadcast %cst_57 : f32 to vector<2x128xf32>
    %247 = arith.addf %246, %245 : vector<2x128xf32>
    %248 = arith.divf %246, %247 : vector<2x128xf32>
    %249 = vector.extract_strided_slice %238 {offsets = [0, 128], sizes = [2, 128], strides = [1, 1]} : vector<2x384xf32> to vector<2x128xf32>
    %250 = vector.extract_strided_slice %240 {offsets = [0, 128], sizes = [2, 128], strides = [1, 1]} : vector<2x384xf32> to vector<2x128xf32>
    %251 = arith.addf %249, %250 : vector<2x128xf32>
    %252 = arith.negf %251 : vector<2x128xf32>
    %253 = math.exp %252 : vector<2x128xf32>
    %cst_58 = arith.constant 1.000000e+00 : f32
    %254 = vector.broadcast %cst_58 : f32 to vector<2x128xf32>
    %255 = arith.addf %254, %253 : vector<2x128xf32>
    %256 = arith.divf %254, %255 : vector<2x128xf32>
    %257 = vector.extract_strided_slice %238 {offsets = [0, 256], sizes = [2, 128], strides = [1, 1]} : vector<2x384xf32> to vector<2x128xf32>
    %258 = vector.extract_strided_slice %240 {offsets = [0, 256], sizes = [2, 128], strides = [1, 1]} : vector<2x384xf32> to vector<2x128xf32>
    %259 = arith.addf %258, %10 : vector<2x128xf32>
    %260 = arith.mulf %248, %259 : vector<2x128xf32>
    %261 = arith.addf %257, %260 : vector<2x128xf32>
    %262 = math.tanh %261 : vector<2x128xf32>
    %cst_59 = arith.constant 1.000000e+00 : f32
    %263 = vector.broadcast %cst_59 : f32 to vector<2x128xf32>
    %264 = arith.subf %263, %256 : vector<2x128xf32>
    %265 = arith.mulf %264, %262 : vector<2x128xf32>
    %266 = arith.mulf %256, %235 : vector<2x128xf32>
    %267 = arith.addf %265, %266 : vector<2x128xf32>
    %c8_i32 = arith.constant 8 : i32
    %c0_60 = arith.constant 0 : index
    %c0_61 = arith.constant 0 : index
    %268 = vector.load %arg5[%c0_60, %c0_61] : memref<2x128xf32, #tpu.memory_space<vmem>>, vector<2x128xf32>
    tpu.vector_store %arg5[%c0_60, %c0_61], %267 {strides = array<i32>} : memref<2x128xf32, #tpu.memory_space<vmem>>, vector<2x128xf32>,
    return
  }
}

</mosaic_0001>

<bundles_post_ra>
// kernel: tpu_custom_call.1
= control target key start
LH: loop header
LB: loop body
LE: loop exit
PB: predicated region body
PF: predicated region fallthrough
CT: control target
= control target key end

     0   :  { %10 = vsyncpa [#allocation4], 0  ;;  %s2266_s0 = inlined_call_operand.hbm [shape: bf16[16,16], index: 0, kind: input, shape index: {}]   ;;  %s2267_s1 = inlined_call_operand.hbm [shape: bf16[16,384], index: 1, kind: input, shape index: {}]   ;;  %s2268_s2 = inlined_call_operand.hbm [shape: bf16[128,384], index: 2, kind: input, shape index: {}]   ;;  %s2269_s3 = inlined_call_operand.vmem [shape: f32[1,384], index: 3, kind: input, shape index: {}]   ;;  %s2270_s4 = inlined_call_operand.vmem [shape: f32[1,128], index: 4, kind: input, shape index: {}]   ;;  %s2271_s5 = inlined_call_operand.hbm [shape: f32[2,128], index: 5, kind: output, shape index: {}]  }
   0x1   :  { %11 = vsyncpa [#allocation7], 0 }
   0x2   :  { %12 = vsyncpa [#allocation5], 0  ;;  %s1854_s18 = smov [#allocation6]  }
   0x3   :  { %s30_s19 = sshll.u32 %s1854_s18, 4  ;;  %s31_s19 = int_to_ptr.vmem [resolvable:$true] %s30_s19 }
   0x4   :  { %s1776_s20 = scalar_lea.vmem %s31_s19, 384  ;;  %p1781_p1 = scmp.lt.s32.totalorder %s31_s19, %s31_s19 }
   0x5   :  { %p1777_p0 = scmp.ne.s32.totalorder %s31_s19, %s1776_s20  ;;  %p1782_p2 = scmp.lt.s32.totalorder %s1776_s20, %s1776_s20 }
   0x7   :  { %p1783_p3 = por %p1782_p2, %p1781_p1 }
   0x9   :  { %p1784_p4 = pnand %p1783_p3, %p1777_p0 }
   0xb   :  { %1787 = shalt.err (!%p1784_p4)
}
   0xc   :  { %s1855_s21 = smov 192   ;;  %s1856_s22 = smov 12  }
   0xd   :  { %36 = dma.hbm_to_vmem [thread:$0]  %s2267_s1, 384, %s31_s19, [#allocation7], %s1855_s21, %s1855_s21, %s1856_s22  }
   0xe   :  { %s1857_s25 = smov [#allocation3]  }
   0xf   :  { %s18_s26 = sshll.u32 %s1857_s25, 4  ;;  %s19_s26 = int_to_ptr.vmem [resolvable:$true] %s18_s26 }
  0x10   :  { %s1796_s27 = scalar_lea.vmem %s19_s26, 128  ;;  %p1801_p6 = scmp.lt.s32.totalorder %s19_s26, %s19_s26 }
  0x11   :  { %p1797_p5 = scmp.ne.s32.totalorder %s19_s26, %s1796_s27  ;;  %p1802_p7 = scmp.lt.s32.totalorder %s1796_s27, %s1796_s27 }
  0x13   :  { %p1803_p8 = por %p1802_p7, %p1801_p6 }
  0x15   :  { %p1804_p9 = pnand %p1803_p8, %p1797_p5 }
  0x17   :  { %1807 = shalt.err (!%p1804_p9)
}
  0x18   :  { %s1858_s28 = smov 64   ;;  %s1859_s29 = smov 4  }
  0x19   :  { %24 = dma.hbm_to_vmem [thread:$0]  %s2266_s0, 128, %s19_s26, [#allocation4], %s1858_s28, %s1858_s28, %s1859_s29  }
  0x1a   :  { %s1860_s7 = smov [#allocation8]  }
  0x1b   :  { %s42_s8 = sshll.u32 %s1860_s7, 4  ;;  %s43_s8 = int_to_ptr.vmem [resolvable:$true] %s42_s8 }
  0x1c   :  { %s1816_s1 = scalar_lea.vmem %s43_s8, 3072  ;;  %p1821_p11 = scmp.lt.s32.totalorder %s43_s8, %s43_s8 }
  0x1d   :  { %p1817_p10 = scmp.ne.s32.totalorder %s43_s8, %s1816_s1  ;;  %p1822_p12 = scmp.lt.s32.totalorder %s1816_s1, %s1816_s1 }
  0x1f   :  { %p1823_p13 = por %p1822_p12, %p1821_p11 }
  0x21   :  { %p1824_p0 = pnand %p1823_p13, %p1817_p10 }
  0x23   :  { %1827 = shalt.err (!%p1824_p0)
}
  0x24   :  { %48 = dma.hbm_to_vmem [thread:$0]  %s2268_s2, 3072, %s43_s8, [#allocation7], %s1855_s21, %s1855_s21, %s1856_s22  }
  0x25   :  { %1848 = dma.done.wait [#allocation4], 128  }
  0x26   :  { %1849 = vsyncadd [#allocation4], 4294967168 }
  0x27   :  { %1850 = dma.done.wait [#allocation7], 3456  }
  0x28   :  { %1851 = vsyncadd [#allocation7], 4294963840  ;;  %v1861_v0 = vmov 0   ;;  %v1862_v1 = vmov 0.0   ;;  %vm1863_vm0 = vmmov 0   ;;  %v1631_v4 = vld [vmem:[#allocation3] sm:$0xff]   ;;  %v71_v30 = vlaneseq }
  0x29   :  { %143 = vmatprep.mubr.bf16.mxu0 %v1861_v0  ;;  %1451 = vmatprep.subr.bf16.mxu1 %v1862_v1  ;;  %v1628_v2 = vld [vmem:[#allocation6 + $0x4] ss:$12 sps:$4 sm:$0xff]   ;;  %v1630_v3 = vld [vmem:[#allocation6] ss:$12 sps:$4 sm:$0xff]   ;;  %vm107_vm1 = vcmask 130048  }
  0x2a   :  { %1453 = vmatprep.mubr.msk.bf16.mxu1 %vm1863_vm0, %v1862_v1  ;;  %125 = vmatprep.subr.bf16.mxu0 %v1628_v2  ;;  %v1908_v5 = vld [vmem:[#allocation8 + $0xac] ss:$12 sps:$4 sm:$0xff]   ;;  %v1910_v6 = vld [vmem:[#allocation8 + $0xa8] ss:$12 sps:$4 sm:$0xff]   ;;  %v1917_v8 = vld [vmem:[#allocation8 + $0x90] ss:$12 sps:$4 sm:$0xff]  }
  0x2b   :  { %126 = vmatpush1.bf16.msra.mxu0 %v1630_v3  ;;  %v1912_v7 = vld [vmem:[#allocation8 + $0x94] ss:$12 sps:$4 sm:$0xff]   ;;  %v1921_v9 = vld [vmem:[#allocation8 + $0x7c] ss:$12 sps:$4 sm:$0xff]   ;;  %v1923_v10 = vld [vmem:[#allocation8 + $0x78] ss:$12 sps:$4 sm:$0xff]  }
  0x2c   :  { %371 = vmatprep.subr.bf16.mxu0 %v1908_v5  ;;  %v1650_v11 = vld [vmem:[#allocation6 + $0x8] ss:$12 sps:$4 sm:$0xff]   ;;  %v1933_v14 = vld [vmem:[#allocation8 + $0x60] ss:$12 sps:$4 sm:$0xff]   ;;  %v1940_v16 = vld [vmem:[#allocation8 + $0x98] ss:$12 sps:$4 sm:$0xff]  }
  0x2d   :  { %v1927_v12 = vld [vmem:[#allocation8 + $0x64] ss:$12 sps:$4 sm:$0xff]   ;;  %1452 = vmatpush3.bf16.msra.mxu1 %v1650_v11  ;;  %v1936_v15 = vld [vmem:[#allocation8 + $0x4c] ss:$12 sps:$4 sm:$0xff]   ;;  %v1946_v17 = vld [vmem:[#allocation8 + $0x48] ss:$12 sps:$4 sm:$0xff]  }
  0x2e   :  { %1334 = vmatmul.mubr.msk.bf16.vlgmr.msra.gmra.mxu0 %vm107_vm1, %v1631_v4  ;;  %v1929_v13 = vld [vmem:[#allocation8 + $0xb0] ss:$12 sps:$4 sm:$0xff]   ;;  %1457 = vmatprep.subr.bf16.mxu1 %v1862_v1  ;;  %v1949_v18 = vld [vmem:[#allocation8 + $0x34] ss:$12 sps:$4 sm:$0xff]   ;;  %v1966_v23 = vld [vmem:[#allocation8 + $0x18] ss:$12 sps:$4 sm:$0xff]  }
  0x2f   :  { %372 = vmatpush1.bf16.msra.mxu0 %v1910_v6  ;;  %403 = vmatprep.mubr.bf16.mxu0 %v1861_v0  ;;  %v1952_v19 = vld [vmem:[#allocation8 + $0x80] ss:$12 sps:$4 sm:$0xff]   ;;  %v1956_v20 = vld [vmem:[#allocation8 + $0x30] ss:$12 sps:$4 sm:$0xff]   ;;  %v1962_v22 = vld [vmem:[#allocation8 + $0x68] ss:$12 sps:$4 sm:$0xff]  }
  0x30   :  { %373 = vmatprep.subr.bf16.mxu0 %v1912_v7  ;;  %1454 = vmatmul.mubr.msk.bf16.vlgmr.msra.gmra.mxu1 %vm107_vm1, %v1631_v4  ;;  %v1959_v21 = vld [vmem:[#allocation8 + $0x1c] ss:$12 sps:$4 sm:$0xff]   ;;  %v1969_v24 = vld [vmem:[#allocation8 + $0x4] ss:$12 sps:$4 sm:$0xff]   ;;  %v1976_v26 = vld [vmem:[#allocation8] ss:$12 sps:$4 sm:$0xff]  }
  0x31   :  { %1458 = vmatpush3.bf16.msra.mxu1 %v1929_v13  ;;  %1473 = vmatprep.mubr.msk.bf16.mxu1 %vm1863_vm0, %v1862_v1  ;;  %v1972_v25 = vld [vmem:[#allocation8 + $0x50] ss:$12 sps:$4 sm:$0xff]   ;;  %v1980_v27 = vld [vmem:[#allocation8 + $0x38] ss:$12 sps:$4 sm:$0xff]   ;;  %v1986_v28 = vld [vmem:[#allocation8 + $0x20] ss:$12 sps:$4 sm:$0xff]  }
  0x32   :  { %1459 = vmatprep.subr.bf16.mxu1 %v1862_v1  ;;  %v1994_v29 = vld [vmem:[#allocation8 + $0x8] ss:$12 sps:$4 sm:$0xff]   ;;  %v72_v31 = vshrl.u32 %v71_v30, 7  ;;  %v69_v33 = vld [vmem:[%s2269_s3] sm:$0x7] }
  0x33   :  { %374 = vmatpush1.bf16.msra.mxu0 %v1917_v8 }
  0x34   :  { %375 = vmatprep.subr.bf16.mxu0 %v1921_v9  ;;  %v73_v32 = vsub.s32 0, %v72_v31  ;;  %v77_v34 = vsub.s32 1, %v72_v31  ;;  %v81_v41 = vsub.s32 2, %v72_v31 }
  0x35   :  { %1460 = vmatpush3.bf16.msra.mxu1 %v1940_v16 }
  0x36   :  { %1461 = vmatprep.subr.bf16.mxu1 %v1862_v1  ;;  %v74_v35 = vrot.slane %v69_v33, %v73_v32  ;;  %v78_v36 = vrot.slane %v69_v33, %v77_v34  ;;  %v82_v46 = vrot.slane %v69_v33, %v81_v41  ;;  %v2038_v32 = vld [vmem:[%s2270_s4] ss:$0 sm:$0xff]  ;;  %s1864_s4 = smov [#allocation9]  }
  0x37   :  { %376 = vmatpush1.bf16.msra.mxu0 %v1923_v10  ;;  %s1320_s12 = sshll.u32 %s1864_s4, 4  ;;  %s1321_s12 = int_to_ptr.vmem [resolvable:$true] %s1320_s12 }
  0x38   :  { %377 = vmatprep.subr.bf16.mxu0 %v1927_v12  ;;  %s1828_s13 = scalar_lea.vmem %s1321_s12, 32  ;;  %p1833_p2 = scmp.lt.s32.totalorder %s1321_s12, %s1321_s12 }
  0x39   :  { %1462 = vmatpush3.bf16.msra.mxu1 %v1952_v19  ;;  %p1829_p1 = scmp.ne.s32.totalorder %s1321_s12, %s1828_s13  ;;  %p1834_p3 = scmp.lt.s32.totalorder %s1828_s13, %s1828_s13 }
  0x3a   :  { %1463 = vmatprep.subr.bf16.mxu1 %v1862_v1 }
  0x3b   :  { %378 = vmatpush1.bf16.msra.mxu0 %v1933_v14  ;;  %p1835_p4 = por %p1834_p3, %p1833_p2 }
  0x3c   :  { %379 = vmatprep.subr.bf16.mxu0 %v1936_v15 }
  0x3d   :  { %1464 = vmatpush3.bf16.msra.mxu1 %v1962_v22  ;;  %p1836_p5 = pnand %p1835_p4, %p1829_p1 }
  0x3e   :  { %1465 = vmatprep.subr.bf16.mxu1 %v1862_v1 }
  0x3f   :  { %380 = vmatpush1.bf16.msra.mxu0 %v1946_v17 }
  0x40   :  { %381 = vmatprep.subr.bf16.mxu0 %v1949_v18 }
  0x41   :  { %1466 = vmatpush3.bf16.msra.mxu1 %v1972_v25 }
  0x42   :  { %1467 = vmatprep.subr.bf16.mxu1 %v1862_v1 }
  0x43   :  { %382 = vmatpush1.bf16.msra.mxu0 %v1956_v20 }
  0x44   :  { %383 = vmatprep.subr.bf16.mxu0 %v1959_v21 }
  0x45   :  { %1468 = vmatpush3.bf16.msra.mxu1 %v1980_v27 }
  0x46   :  { %1469 = vmatprep.subr.bf16.mxu1 %v1862_v1 }
  0x47   :  { %384 = vmatpush1.bf16.msra.mxu0 %v1966_v23 }
  0x48   :  { %385 = vmatprep.subr.bf16.mxu0 %v1969_v24 }
  0x49   :  { %1470 = vmatpush3.bf16.msra.mxu1 %v1986_v28 }
  0x4a   :  { %1471 = vmatprep.subr.bf16.mxu1 %v1862_v1 }
  0x4b   :  { %386 = vmatpush1.bf16.msra.mxu0 %v1976_v26 }
  0x4c   :  { %478 = vmatprep.subr.bf16.mxu0 %v1908_v5 }
  0x4d   :  { %1472 = vmatpush3.bf16.msra.mxu1 %v1994_v29 }
  0x4e   :  { %404 = vmatmul.mubr.bf16.vlgmr.msra.gmra.mxu0 %v1861_v0  ;;  %1477 = vmatprep.subr.bf16.mxu1 %v1862_v1 }
  0x4f   :  { %479 = vmatpush1.bf16.msra.mxu0 %v1910_v6  ;;  %510 = vmatprep.mubr.bf16.mxu0 %v1861_v0 }
  0x50   :  { %480 = vmatprep.subr.bf16.mxu0 %v1912_v7  ;;  %1474 = vmatmul.mubr.bf16.vlgmr.msra.gmra.mxu1 %v1861_v0 }
  0x51   :  { %1478 = vmatpush3.bf16.msra.mxu1 %v1929_v13  ;;  %1493 = vmatprep.mubr.msk.bf16.mxu1 %vm1863_vm0, %v1862_v1 }
  0x52   :  { %1479 = vmatprep.subr.bf16.mxu1 %v1862_v1 }
  0x53   :  { %481 = vmatpush1.bf16.msra.mxu0 %v1917_v8 }
  0x54   :  { %482 = vmatprep.subr.bf16.mxu0 %v1921_v9 }
  0x55   :  { %1480 = vmatpush3.bf16.msra.mxu1 %v1940_v16 }
  0x56   :  { %1481 = vmatprep.subr.bf16.mxu1 %v1862_v1 }
  0x57   :  { %483 = vmatpush1.bf16.msra.mxu0 %v1923_v10 }
  0x58   :  { %484 = vmatprep.subr.bf16.mxu0 %v1927_v12 }
  0x59   :  { %1482 = vmatpush3.bf16.msra.mxu1 %v1952_v19 }
  0x5a   :  { %1483 = vmatprep.subr.bf16.mxu1 %v1862_v1 }
  0x5b   :  { %485 = vmatpush1.bf16.msra.mxu0 %v1933_v14 }
  0x5c   :  { %486 = vmatprep.subr.bf16.mxu0 %v1936_v15 }
  0x5d   :  { %1484 = vmatpush3.bf16.msra.mxu1 %v1962_v22 }
  0x5e   :  { %1485 = vmatprep.subr.bf16.mxu1 %v1862_v1 }
  0x5f   :  { %487 = vmatpush1.bf16.msra.mxu0 %v1946_v17 }
  0x60   :  { %488 = vmatprep.subr.bf16.mxu0 %v1949_v18 }
  0x61   :  { %1486 = vmatpush3.bf16.msra.mxu1 %v1972_v25 }
  0x62   :  { %1487 = vmatprep.subr.bf16.mxu1 %v1862_v1 }
  0x63   :  { %489 = vmatpush1.bf16.msra.mxu0 %v1956_v20 }
  0x64   :  { %490 = vmatprep.subr.bf16.mxu0 %v1959_v21 }
  0x65   :  { %1488 = vmatpush3.bf16.msra.mxu1 %v1980_v27 }
  0x66   :  { %1489 = vmatprep.subr.bf16.mxu1 %v1862_v1 }
  0x67   :  { %491 = vmatpush1.bf16.msra.mxu0 %v1966_v23 }
  0x68   :  { %492 = vmatprep.subr.bf16.mxu0 %v1969_v24 }
  0x69   :  { %1490 = vmatpush3.bf16.msra.mxu1 %v1986_v28 }
  0x6a   :  { %1491 = vmatprep.subr.bf16.mxu1 %v1862_v1 }
  0x6b   :  { %493 = vmatpush1.bf16.msra.mxu0 %v1976_v26 }
  0x6c   :  { %600 = vmatprep.subr.bf16.mxu0 %v1908_v5 }
  0x6d   :  { %1492 = vmatpush3.bf16.msra.mxu1 %v1994_v29 }
  0x6e   :  { %1497 = vmatprep.subr.bf16.mxu1 %v1862_v1 }
  0xee   :  { %v145_v37 = vpop.f32.mrf.mxu0 }
  0xef   :  { %v146_v38 = vadd.f32 %v145_v37, %v74_v35 }
  0xf0   :  { %v147_v39 = vpop.f32.mrf.mxu0  ;;  %v188_v47 = vpop.f32.mrf.mxu1 }
  0xf1   :  { %195 = vst [vmem:[#allocation2 + $0x28] sm:$0xff] %v146_v38  ;;  %v148_v40 = vadd.f32 %v147_v39, %v78_v36  ;;  %v189_v48 = vadd.f32 %v188_v47, %v82_v46 }
  0xf2   :  { %v149_v42 = vpop.f32.mrf.mxu0  ;;  %v1455_v49 = vpop.f32.mrf.mxu1 }
  0xf3   :  { %196 = vst [vmem:[#allocation2 + $0x10] sm:$0xff] %v148_v40  ;;  %v150_v43 = vadd.f32 %v149_v42, %v74_v35  ;;  %197 = vst [vmem:[#allocation2 + $0x8] sm:$0xff] %v189_v48 }
  0xf4   :  { %v151_v44 = vpop.f32.mrf.mxu0  ;;  %v191_v50 = vpop.f32.mrf.mxu1 }
  0xf5   :  { %198 = vst [vmem:[#allocation2] sm:$0xff] %v150_v43  ;;  %v152_v45 = vadd.f32 %v151_v44, %v78_v36  ;;  %v192_v51 = vadd.f32 %v191_v50, %v82_v46 }
  0xf6   :  { %v1456_v52 = vpop.f32.mrf.mxu1 }
  0xf7   :  { %199 = vst [vmem:[#allocation2 + $0x18] sm:$0xff] %v152_v45  ;;  %200 = vst [vmem:[#allocation2 + $0x20] sm:$0xff] %v192_v51 }
  0xf8   :  { %v240_v53 = vld [vmem:[#allocation2 + $0x28] sm:$0x3]  ;;  %v474_v49 = vld [vmem:[#allocation2 + $0x28] sm:$0xc] }
  0xfa   :  { %v241_v59 = vld [vmem:[#allocation2 + $0x10] sm:$0x3]  ;;  %v242_v37 = vld [vmem:[#allocation2 + $0x8] sm:$0x3] }
 0x10e   :  { %v405_v54 = vpop.f32.mrf.mxu0 }
 0x10f   :  { %v452_v55 = vadd.f32 %v405_v54, %v240_v53 }
 0x110   :  { %v407_v56 = vpop.f32.mrf.mxu0  ;;  %v446_v62 = vpop.f32.mrf.mxu1 }
 0x111   :  { %v1361_v57 = vmul.f32 -1.442695, %v452_v55  ;;  %v459_v61 = vadd.f32 %v407_v56, %v241_v59  ;;  %v466_v34 = vadd.f32 %v2038_v32, %v446_v62  ;;  %v475_v59 = vld [vmem:[#allocation2 + $0x10] sm:$0xc] }
 0x112   :  { %v409_v58 = vpop.f32.mrf.mxu0  ;;  %v1475_v2 = vpop.f32.mrf.mxu1 }
 0x113   :  { %1665 = vpow2.f32 %v1361_v57  ;;  %v1362_v63 = vmul.f32 -1.442695, %v459_v61 }
 0x114   :  { %v410_v60 = vpop.f32.mrf.mxu0  ;;  %v449_v3 = vpop.f32.mrf.mxu1 }
 0x115   :  { %1667 = vpow2.f32 %v1362_v63 }
 0x116   :  { %v1476_v4 = vpop.f32.mrf.mxu1 }
 0x120   :  { %v1666_v11 = vpop.eup %1665 }
 0x121   :  { %v456_v30 = vadd.f32 1.0, %v1666_v11 }
 0x122   :  { %v1668_v31 = vpop.eup %1667 }
 0x123   :  { %1669 = vrcp.f32 %v456_v30  ;;  %v463_v33 = vadd.f32 1.0, %v1668_v31 }
 0x125   :  { %1671 = vrcp.f32 %v463_v33  ;;  %v476_v33 = vld [vmem:[#allocation2 + $0x8] sm:$0xc] }
 0x130   :  { %v1670_v35 = vpop.eup %1669 }
 0x131   :  { %v467_v36 = vmul.f32 %v1670_v35, %v466_v34 }
 0x132   :  { %v1672_v39 = vpop.eup %1671 }
 0x133   :  { %v468_v38 = vadd.f32 %v467_v36, %v242_v37  ;;  %v470_v40 = vsub.f32 1.0, %v1672_v39  ;;  %v472_v43 = vmul.f32 0.0, %v1672_v39 }
 0x135   :  { %1673 = vtanh.f32 %v468_v38 }
 0x142   :  { %v1674_v41 = vpop.eup %1673 }
 0x143   :  { %v471_v42 = vmul.f32 %v1674_v41, %v470_v40 }
 0x145   :  { %v2041_v44 = vadd.f32 %v472_v43, %v471_v42 }
 0x147   :  { %v477_v45 = vpack.c.bf16 %v2041_v44, %v2041_v44  ;;  %v589_v36 = vrot.slane %v2041_v44, 6 }
 0x149   :  { %511 = vmatmul.mubr.bf16.vlgmr.msra.gmra.mxu0 %v477_v45  ;;  %1494 = vmatmul.mubr.bf16.vlgmr.msra.gmra.mxu1 %v477_v45 }
 0x14a   :  { %601 = vmatpush1.bf16.msra.mxu0 %v1910_v6  ;;  %1498 = vmatpush3.bf16.msra.mxu1 %v1929_v13 }
 0x14b   :  { %602 = vmatprep.subr.bf16.mxu0 %v1912_v7  ;;  %1499 = vmatprep.subr.bf16.mxu1 %v1862_v1 }
 0x14c   :  { %632 = vmatprep.mubr.bf16.mxu0 %v1861_v0  ;;  %1513 = vmatprep.mubr.msk.bf16.mxu1 %vm1863_vm0, %v1862_v1 }
 0x14e   :  { %603 = vmatpush1.bf16.msra.mxu0 %v1917_v8  ;;  %1500 = vmatpush3.bf16.msra.mxu1 %v1940_v16 }
 0x14f   :  { %604 = vmatprep.subr.bf16.mxu0 %v1921_v9  ;;  %1501 = vmatprep.subr.bf16.mxu1 %v1862_v1 }
 0x152   :  { %605 = vmatpush1.bf16.msra.mxu0 %v1923_v10  ;;  %1502 = vmatpush3.bf16.msra.mxu1 %v1952_v19 }
 0x153   :  { %606 = vmatprep.subr.bf16.mxu0 %v1927_v12  ;;  %1503 = vmatprep.subr.bf16.mxu1 %v1862_v1 }
 0x156   :  { %607 = vmatpush1.bf16.msra.mxu0 %v1933_v14  ;;  %1504 = vmatpush3.bf16.msra.mxu1 %v1962_v22 }
 0x157   :  { %608 = vmatprep.subr.bf16.mxu0 %v1936_v15  ;;  %1505 = vmatprep.subr.bf16.mxu1 %v1862_v1 }
 0x15a   :  { %609 = vmatpush1.bf16.msra.mxu0 %v1946_v17  ;;  %1506 = vmatpush3.bf16.msra.mxu1 %v1972_v25 }
 0x15b   :  { %610 = vmatprep.subr.bf16.mxu0 %v1949_v18  ;;  %1507 = vmatprep.subr.bf16.mxu1 %v1862_v1 }
 0x15e   :  { %611 = vmatpush1.bf16.msra.mxu0 %v1956_v20  ;;  %1508 = vmatpush3.bf16.msra.mxu1 %v1980_v27 }
 0x15f   :  { %612 = vmatprep.subr.bf16.mxu0 %v1959_v21  ;;  %1509 = vmatprep.subr.bf16.mxu1 %v1862_v1 }
 0x162   :  { %613 = vmatpush1.bf16.msra.mxu0 %v1966_v23  ;;  %1510 = vmatpush3.bf16.msra.mxu1 %v1986_v28 }
 0x163   :  { %614 = vmatprep.subr.bf16.mxu0 %v1969_v24  ;;  %1511 = vmatprep.subr.bf16.mxu1 %v1862_v1 }
 0x166   :  { %615 = vmatpush1.bf16.msra.mxu0 %v1976_v26  ;;  %1512 = vmatpush3.bf16.msra.mxu1 %v1994_v29 }
 0x167   :  { %722 = vmatprep.subr.bf16.mxu0 %v1908_v5  ;;  %1517 = vmatprep.subr.bf16.mxu1 %v1862_v1 }
 0x209   :  { %v512_v46 = vpop.f32.mrf.mxu0  ;;  %v553_v47 = vpop.f32.mrf.mxu1 }
 0x20a   :  { %v560_v48 = vrot.slane %v512_v46, 6  ;;  %v579_v3 = vadd.f32 %v2038_v32, %v553_v47  ;;  %v593_v47 = vld [vmem:[#allocation2 + $0x28] sm:$0x30] }
 0x20b   :  { %v514_v50 = vpop.f32.mrf.mxu0  ;;  %v1495_v51 = vpop.f32.mrf.mxu1 }
 0x20c   :  { %v562_v52 = vadd.f32 %v560_v48, %v474_v49  ;;  %v570_v56 = vrot.slane %v514_v50, 6  ;;  %v581_v11 = vrot.slane %v579_v3, 6 }
 0x20d   :  { %v516_v53 = vpop.f32.mrf.mxu0  ;;  %v556_v54 = vpop.f32.mrf.mxu1 }
 0x20e   :  { %v1363_v55 = vmul.f32 -1.442695, %v562_v52  ;;  %v572_v60 = vadd.f32 %v570_v56, %v475_v59 }
 0x20f   :  { %v517_v57 = vpop.f32.mrf.mxu0  ;;  %v1496_v58 = vpop.f32.mrf.mxu1 }
 0x210   :  { %1675 = vpow2.f32 %v1363_v55  ;;  %v1364_v61 = vmul.f32 -1.442695, %v572_v60  ;;  %v594_v57 = vld [vmem:[#allocation2 + $0x10] sm:$0x30] }
 0x212   :  { %1677 = vpow2.f32 %v1364_v61 }
 0x21d   :  { %v1676_v62 = vpop.eup %1675 }
 0x21e   :  { %v566_v63 = vadd.f32 1.0, %v1676_v62 }
 0x21f   :  { %v1678_v2 = vpop.eup %1677 }
 0x220   :  { %1679 = vrcp.f32 %v566_v63  ;;  %v576_v4 = vadd.f32 1.0, %v1678_v2 }
 0x222   :  { %1681 = vrcp.f32 %v576_v4 }
 0x22d   :  { %v1680_v30 = vpop.eup %1679 }
 0x22e   :  { %v583_v31 = vmul.f32 %v1680_v30, %v581_v11  ;;  %v595_v30 = vld [vmem:[#allocation2 + $0x8] sm:$0x30] }
 0x22f   :  { %v1682_v35 = vpop.eup %1681 }
 0x230   :  { %v584_v34 = vadd.f32 %v583_v31, %v476_v33  ;;  %v586_v37 = vsub.f32 1.0, %v1682_v35  ;;  %v591_v40 = vmul.f32 %v1682_v35, %v589_v36 }
 0x232   :  { %1683 = vtanh.f32 %v584_v34 }
 0x23f   :  { %v1684_v38 = vpop.eup %1683 }
 0x240   :  { %v587_v39 = vmul.f32 %v1684_v38, %v586_v37 }
 0x242   :  { %v2082_v41 = vadd.f32 %v591_v40, %v587_v39 }
 0x244   :  { %v596_v42 = vpack.c.bf16 %v2082_v41, %v2082_v41  ;;  %v711_v34 = vrot.slane %v2082_v41, 6 }
 0x246   :  { %v598_v43 = vrot.slane %v596_v42, 1 }
 0x248   :  { %633 = vmatmul.mubr.bf16.vlgmr.msra.gmra.mxu0 %v598_v43  ;;  %1514 = vmatmul.mubr.bf16.vlgmr.msra.gmra.mxu1 %v598_v43 }
 0x249   :  { %723 = vmatpush1.bf16.msra.mxu0 %v1910_v6  ;;  %1518 = vmatpush3.bf16.msra.mxu1 %v1929_v13 }
 0x24a   :  { %724 = vmatprep.subr.bf16.mxu0 %v1912_v7  ;;  %1519 = vmatprep.subr.bf16.mxu1 %v1862_v1 }
 0x24b   :  { %754 = vmatprep.mubr.bf16.mxu0 %v1861_v0  ;;  %1533 = vmatprep.mubr.msk.bf16.mxu1 %vm1863_vm0, %v1862_v1 }
 0x24d   :  { %725 = vmatpush1.bf16.msra.mxu0 %v1917_v8  ;;  %1520 = vmatpush3.bf16.msra.mxu1 %v1940_v16 }
 0x24e   :  { %726 = vmatprep.subr.bf16.mxu0 %v1921_v9  ;;  %1521 = vmatprep.subr.bf16.mxu1 %v1862_v1 }
 0x251   :  { %727 = vmatpush1.bf16.msra.mxu0 %v1923_v10  ;;  %1522 = vmatpush3.bf16.msra.mxu1 %v1952_v19 }
 0x252   :  { %728 = vmatprep.subr.bf16.mxu0 %v1927_v12  ;;  %1523 = vmatprep.subr.bf16.mxu1 %v1862_v1 }
 0x255   :  { %729 = vmatpush1.bf16.msra.mxu0 %v1933_v14  ;;  %1524 = vmatpush3.bf16.msra.mxu1 %v1962_v22 }
 0x256   :  { %730 = vmatprep.subr.bf16.mxu0 %v1936_v15  ;;  %1525 = vmatprep.subr.bf16.mxu1 %v1862_v1 }
 0x259   :  { %731 = vmatpush1.bf16.msra.mxu0 %v1946_v17  ;;  %1526 = vmatpush3.bf16.msra.mxu1 %v1972_v25 }
 0x25a   :  { %732 = vmatprep.subr.bf16.mxu0 %v1949_v18  ;;  %1527 = vmatprep.subr.bf16.mxu1 %v1862_v1 }
 0x25d   :  { %733 = vmatpush1.bf16.msra.mxu0 %v1956_v20  ;;  %1528 = vmatpush3.bf16.msra.mxu1 %v1980_v27 }
 0x25e   :  { %734 = vmatprep.subr.bf16.mxu0 %v1959_v21  ;;  %1529 = vmatprep.subr.bf16.mxu1 %v1862_v1 }
 0x261   :  { %735 = vmatpush1.bf16.msra.mxu0 %v1966_v23  ;;  %1530 = vmatpush3.bf16.msra.mxu1 %v1986_v28 }
 0x262   :  { %736 = vmatprep.subr.bf16.mxu0 %v1969_v24  ;;  %1531 = vmatprep.subr.bf16.mxu1 %v1862_v1 }
 0x265   :  { %737 = vmatpush1.bf16.msra.mxu0 %v1976_v26  ;;  %1532 = vmatpush3.bf16.msra.mxu1 %v1994_v29 }
 0x266   :  { %844 = vmatprep.subr.bf16.mxu0 %v1908_v5  ;;  %1537 = vmatprep.subr.bf16.mxu1 %v1862_v1 }
 0x308   :  { %v634_v44 = vpop.f32.mrf.mxu0  ;;  %v675_v45 = vpop.f32.mrf.mxu1 }
 0x309   :  { %v682_v46 = vrot.slane %v634_v44, 4  ;;  %v701_v63 = vadd.f32 %v2038_v32, %v675_v45  ;;  %v715_v45 = vld [vmem:[#allocation2 + $0x28] sm:$0xc0] }
 0x30a   :  { %v636_v48 = vpop.f32.mrf.mxu0  ;;  %v1515_v49 = vpop.f32.mrf.mxu1 }
 0x30b   :  { %v684_v50 = vadd.f32 %v682_v46, %v593_v47  ;;  %v692_v54 = vrot.slane %v636_v48, 4  ;;  %v703_v3 = vrot.slane %v701_v63, 4 }
 0x30c   :  { %v638_v51 = vpop.f32.mrf.mxu0  ;;  %v678_v52 = vpop.f32.mrf.mxu1 }
 0x30d   :  { %v1365_v53 = vmul.f32 -1.442695, %v684_v50  ;;  %v694_v58 = vadd.f32 %v692_v54, %v594_v57 }
 0x30e   :  { %v639_v55 = vpop.f32.mrf.mxu0  ;;  %v1516_v56 = vpop.f32.mrf.mxu1 }
 0x30f   :  { %1685 = vpow2.f32 %v1365_v53  ;;  %v1366_v59 = vmul.f32 -1.442695, %v694_v58  ;;  %v716_v55 = vld [vmem:[#allocation2 + $0x10] sm:$0xc0] }
 0x311   :  { %1687 = vpow2.f32 %v1366_v59 }
 0x31c   :  { %v1686_v60 = vpop.eup %1685 }
 0x31d   :  { %v688_v61 = vadd.f32 1.0, %v1686_v60 }
 0x31e   :  { %v1688_v62 = vpop.eup %1687 }
 0x31f   :  { %1689 = vrcp.f32 %v688_v61  ;;  %v698_v2 = vadd.f32 1.0, %v1688_v62 }
 0x321   :  { %1691 = vrcp.f32 %v698_v2 }
 0x32c   :  { %v1690_v4 = vpop.eup %1689 }
 0x32d   :  { %v705_v11 = vmul.f32 %v1690_v4, %v703_v3  ;;  %v717_v4 = vld [vmem:[#allocation2 + $0x8] sm:$0xc0] }
 0x32e   :  { %v1692_v33 = vpop.eup %1691 }
 0x32f   :  { %v706_v31 = vadd.f32 %v705_v11, %v595_v30  ;;  %v708_v35 = vsub.f32 1.0, %v1692_v33  ;;  %v713_v38 = vmul.f32 %v1692_v33, %v711_v34 }
 0x331   :  { %1693 = vtanh.f32 %v706_v31 }
 0x33e   :  { %v1694_v36 = vpop.eup %1693 }
 0x33f   :  { %v709_v37 = vmul.f32 %v1694_v36, %v708_v35 }
 0x341   :  { %v2123_v39 = vadd.f32 %v713_v38, %v709_v37 }
 0x343   :  { %v718_v40 = vpack.c.bf16 %v2123_v39, %v2123_v39  ;;  %v833_v31 = vrot.slane %v2123_v39, 6  ;;  %v837_v39 = vld [vmem:[#allocation2] sm:$0x3] }
 0x345   :  { %v720_v42 = vrot.slane %v718_v40, 2 }
 0x347   :  { %755 = vmatmul.mubr.bf16.vlgmr.msra.gmra.mxu0 %v720_v42  ;;  %1534 = vmatmul.mubr.bf16.vlgmr.msra.gmra.mxu1 %v720_v42 }
 0x348   :  { %845 = vmatpush1.bf16.msra.mxu0 %v1910_v6  ;;  %1538 = vmatpush3.bf16.msra.mxu1 %v1929_v13 }
 0x349   :  { %846 = vmatprep.subr.bf16.mxu0 %v1912_v7  ;;  %1539 = vmatprep.subr.bf16.mxu1 %v1862_v1 }
 0x34a   :  { %876 = vmatprep.mubr.bf16.mxu0 %v1861_v0  ;;  %1553 = vmatprep.mubr.msk.bf16.mxu1 %vm1863_vm0, %v1862_v1 }
 0x34c   :  { %847 = vmatpush1.bf16.msra.mxu0 %v1917_v8  ;;  %1540 = vmatpush3.bf16.msra.mxu1 %v1940_v16 }
 0x34d   :  { %848 = vmatprep.subr.bf16.mxu0 %v1921_v9  ;;  %1541 = vmatprep.subr.bf16.mxu1 %v1862_v1 }
 0x350   :  { %849 = vmatpush1.bf16.msra.mxu0 %v1923_v10  ;;  %1542 = vmatpush3.bf16.msra.mxu1 %v1952_v19 }
 0x351   :  { %850 = vmatprep.subr.bf16.mxu0 %v1927_v12  ;;  %1543 = vmatprep.subr.bf16.mxu1 %v1862_v1 }
 0x354   :  { %851 = vmatpush1.bf16.msra.mxu0 %v1933_v14  ;;  %1544 = vmatpush3.bf16.msra.mxu1 %v1962_v22 }
 0x355   :  { %852 = vmatprep.subr.bf16.mxu0 %v1936_v15  ;;  %1545 = vmatprep.subr.bf16.mxu1 %v1862_v1 }
 0x358   :  { %853 = vmatpush1.bf16.msra.mxu0 %v1946_v17  ;;  %1546 = vmatpush3.bf16.msra.mxu1 %v1972_v25 }
 0x359   :  { %854 = vmatprep.subr.bf16.mxu0 %v1949_v18  ;;  %1547 = vmatprep.subr.bf16.mxu1 %v1862_v1 }
 0x35c   :  { %855 = vmatpush1.bf16.msra.mxu0 %v1956_v20  ;;  %1548 = vmatpush3.bf16.msra.mxu1 %v1980_v27 }
 0x35d   :  { %856 = vmatprep.subr.bf16.mxu0 %v1959_v21  ;;  %1549 = vmatprep.subr.bf16.mxu1 %v1862_v1 }
 0x360   :  { %857 = vmatpush1.bf16.msra.mxu0 %v1966_v23  ;;  %1550 = vmatpush3.bf16.msra.mxu1 %v1986_v28 }
 0x361   :  { %858 = vmatprep.subr.bf16.mxu0 %v1969_v24  ;;  %1551 = vmatprep.subr.bf16.mxu1 %v1862_v1 }
 0x364   :  { %859 = vmatpush1.bf16.msra.mxu0 %v1976_v26  ;;  %1552 = vmatpush3.bf16.msra.mxu1 %v1994_v29 }
 0x365   :  { %954 = vmatprep.subr.bf16.mxu0 %v1908_v5  ;;  %1557 = vmatprep.subr.bf16.mxu1 %v1862_v1 }
 0x407   :  { %v756_v41 = vpop.f32.mrf.mxu0  ;;  %v797_v43 = vpop.f32.mrf.mxu1 }
 0x408   :  { %v804_v44 = vrot.slane %v756_v41, 2  ;;  %v823_v61 = vadd.f32 %v2038_v32, %v797_v43 }
 0x409   :  { %v758_v46 = vpop.f32.mrf.mxu0  ;;  %v1535_v47 = vpop.f32.mrf.mxu1 }
 0x40a   :  { %v806_v48 = vadd.f32 %v804_v44, %v715_v45  ;;  %v814_v52 = vrot.slane %v758_v46, 2  ;;  %v825_v63 = vrot.slane %v823_v61, 2 }
 0x40b   :  { %v760_v49 = vpop.f32.mrf.mxu0  ;;  %v800_v50 = vpop.f32.mrf.mxu1 }
 0x40c   :  { %v1367_v51 = vmul.f32 -1.442695, %v806_v48  ;;  %v816_v56 = vadd.f32 %v814_v52, %v716_v55  ;;  %v838_v49 = vld [vmem:[#allocation2 + $0x18] sm:$0x3] }
 0x40d   :  { %v761_v53 = vpop.f32.mrf.mxu0  ;;  %v1536_v54 = vpop.f32.mrf.mxu1 }
 0x40e   :  { %1695 = vpow2.f32 %v1367_v51  ;;  %v1368_v57 = vmul.f32 -1.442695, %v816_v56 }
 0x410   :  { %1697 = vpow2.f32 %v1368_v57 }
 0x41b   :  { %v1696_v58 = vpop.eup %1695 }
 0x41c   :  { %v810_v59 = vadd.f32 1.0, %v1696_v58 }
 0x41d   :  { %v1698_v60 = vpop.eup %1697 }
 0x41e   :  { %1699 = vrcp.f32 %v810_v59  ;;  %v820_v62 = vadd.f32 1.0, %v1698_v60  ;;  %v839_v60 = vld [vmem:[#allocation2 + $0x20] sm:$0x3] }
 0x420   :  { %1701 = vrcp.f32 %v820_v62 }
 0x42b   :  { %v1700_v2 = vpop.eup %1699 }
 0x42c   :  { %v827_v3 = vmul.f32 %v1700_v2, %v825_v63 }
 0x42d   :  { %v1702_v30 = vpop.eup %1701 }
 0x42e   :  { %v828_v11 = vadd.f32 %v827_v3, %v717_v4  ;;  %v830_v33 = vsub.f32 1.0, %v1702_v30  ;;  %v835_v36 = vmul.f32 %v1702_v30, %v833_v31 }
 0x430   :  { %1703 = vtanh.f32 %v828_v11 }
 0x43d   :  { %v1704_v34 = vpop.eup %1703 }
 0x43e   :  { %v831_v35 = vmul.f32 %v1704_v34, %v830_v33 }
 0x440   :  { %v2164_v37 = vadd.f32 %v835_v36, %v831_v35  ;;  %v952_v36 = vld [vmem:[#allocation2 + $0x20] sm:$0xc] }
 0x442   :  { %v840_v38 = vpack.c.bf16 %v2164_v37, %v2164_v37  ;;  %v946_v63 = vrot.slane %v2164_v37, 6 }
 0x444   :  { %v842_v40 = vrot.slane %v840_v38, 3 }
 0x446   :  { %877 = vmatmul.mubr.bf16.vlgmr.msra.gmra.mxu0 %v842_v40  ;;  %1554 = vmatmul.mubr.bf16.vlgmr.msra.gmra.mxu1 %v842_v40 }
 0x447   :  { %955 = vmatpush1.bf16.msra.mxu0 %v1910_v6  ;;  %1558 = vmatpush3.bf16.msra.mxu1 %v1929_v13 }
 0x448   :  { %956 = vmatprep.subr.bf16.mxu0 %v1912_v7  ;;  %1559 = vmatprep.subr.bf16.mxu1 %v1862_v1 }
 0x449   :  { %986 = vmatprep.mubr.bf16.mxu0 %v1861_v0  ;;  %1573 = vmatprep.mubr.msk.bf16.mxu1 %vm1863_vm0, %v1862_v1 }
 0x44b   :  { %957 = vmatpush1.bf16.msra.mxu0 %v1917_v8  ;;  %1560 = vmatpush3.bf16.msra.mxu1 %v1940_v16 }
 0x44c   :  { %958 = vmatprep.subr.bf16.mxu0 %v1921_v9  ;;  %1561 = vmatprep.subr.bf16.mxu1 %v1862_v1 }
 0x44f   :  { %959 = vmatpush1.bf16.msra.mxu0 %v1923_v10  ;;  %1562 = vmatpush3.bf16.msra.mxu1 %v1952_v19 }
 0x450   :  { %960 = vmatprep.subr.bf16.mxu0 %v1927_v12  ;;  %1563 = vmatprep.subr.bf16.mxu1 %v1862_v1 }
 0x453   :  { %961 = vmatpush1.bf16.msra.mxu0 %v1933_v14  ;;  %1564 = vmatpush3.bf16.msra.mxu1 %v1962_v22 }
 0x454   :  { %962 = vmatprep.subr.bf16.mxu0 %v1936_v15  ;;  %1565 = vmatprep.subr.bf16.mxu1 %v1862_v1 }
 0x457   :  { %963 = vmatpush1.bf16.msra.mxu0 %v1946_v17  ;;  %1566 = vmatpush3.bf16.msra.mxu1 %v1972_v25 }
 0x458   :  { %964 = vmatprep.subr.bf16.mxu0 %v1949_v18  ;;  %1567 = vmatprep.subr.bf16.mxu1 %v1862_v1 }
 0x45b   :  { %965 = vmatpush1.bf16.msra.mxu0 %v1956_v20  ;;  %1568 = vmatpush3.bf16.msra.mxu1 %v1980_v27 }
 0x45c   :  { %966 = vmatprep.subr.bf16.mxu0 %v1959_v21  ;;  %1569 = vmatprep.subr.bf16.mxu1 %v1862_v1 }
 0x45f   :  { %967 = vmatpush1.bf16.msra.mxu0 %v1966_v23  ;;  %1570 = vmatpush3.bf16.msra.mxu1 %v1986_v28 }
 0x460   :  { %968 = vmatprep.subr.bf16.mxu0 %v1969_v24  ;;  %1571 = vmatprep.subr.bf16.mxu1 %v1862_v1 }
 0x463   :  { %969 = vmatpush1.bf16.msra.mxu0 %v1976_v26  ;;  %1572 = vmatpush3.bf16.msra.mxu1 %v1994_v29 }
 0x464   :  { %1076 = vmatprep.subr.bf16.mxu0 %v1908_v5  ;;  %1577 = vmatprep.subr.bf16.mxu1 %v1862_v1 }
 0x506   :  { %v878_v42 = vpop.f32.mrf.mxu0  ;;  %v919_v41 = vpop.f32.mrf.mxu1 }
 0x507   :  { %v925_v43 = vadd.f32 %v878_v42, %v837_v39  ;;  %v939_v57 = vadd.f32 %v2038_v32, %v919_v41 }
 0x508   :  { %v880_v44 = vpop.f32.mrf.mxu0  ;;  %v1555_v45 = vpop.f32.mrf.mxu1 }
 0x509   :  { %v1369_v46 = vmul.f32 -1.442695, %v925_v43  ;;  %v932_v52 = vadd.f32 %v880_v44, %v838_v49  ;;  %v1748_v49 = vld [vmem:[#allocation8 + $0x94] ss:$12 sps:$4 sm:$0xff]  }
 0x50a   :  { %v882_v47 = vpop.f32.mrf.mxu0  ;;  %v922_v48 = vpop.f32.mrf.mxu1 }
 0x50b   :  { %1705 = vpow2.f32 %v1369_v46  ;;  %v1370_v53 = vmul.f32 -1.442695, %v932_v52  ;;  %v1746_v47 = vld [vmem:[#allocation8 + $0xa8] ss:$12 sps:$4 sm:$0xff]   ;;  %v1747_v48 = vld [vmem:[#allocation8 + $0xb0] ss:$12 sps:$4 sm:$0xff]  }
 0x50c   :  { %v883_v50 = vpop.f32.mrf.mxu0  ;;  %v1556_v51 = vpop.f32.mrf.mxu1  ;;  %v1751_v52 = vld [vmem:[#allocation8 + $0x7c] ss:$12 sps:$4 sm:$0xff]  }
 0x50d   :  { %1707 = vpow2.f32 %v1370_v53  ;;  %v1749_v50 = vld [vmem:[#allocation8 + $0x90] ss:$12 sps:$4 sm:$0xff]   ;;  %v1750_v51 = vld [vmem:[#allocation8 + $0x98] ss:$12 sps:$4 sm:$0xff]  }
 0x50e   :  { %v1752_v53 = vld [vmem:[#allocation8 + $0x78] ss:$12 sps:$4 sm:$0xff]  }
 0x518   :  { %v1706_v54 = vpop.eup %1705 }
 0x519   :  { %v929_v5 = vadd.f32 1.0, %v1706_v54  ;;  %v1753_v54 = vld [vmem:[#allocation8 + $0x80] ss:$12 sps:$4 sm:$0xff]  }
 0x51a   :  { %v1708_v55 = vpop.eup %1707 }
 0x51b   :  { %1709 = vrcp.f32 %v929_v5  ;;  %v936_v56 = vadd.f32 1.0, %v1708_v55  ;;  %v1754_v5 = vld [vmem:[#allocation8 + $0x64] ss:$12 sps:$4 sm:$0xff]   ;;  %v1756_v55 = vld [vmem:[#allocation8 + $0x68] ss:$12 sps:$4 sm:$0xff]  }
 0x51d   :  { %1711 = vrcp.f32 %v936_v56  ;;  %v1757_v56 = vld [vmem:[#allocation8 + $0x4c] ss:$12 sps:$4 sm:$0xff]  }
 0x528   :  { %v1710_v58 = vpop.eup %1709 }
 0x529   :  { %v940_v59 = vmul.f32 %v1710_v58, %v939_v57  ;;  %v1758_v57 = vld [vmem:[#allocation8 + $0x48] ss:$12 sps:$4 sm:$0xff]   ;;  %v1759_v58 = vld [vmem:[#allocation8 + $0x50] ss:$12 sps:$4 sm:$0xff]  }
 0x52a   :  { %v1712_v62 = vpop.eup %1711 }
 0x52b   :  { %v941_v61 = vadd.f32 %v940_v59, %v839_v60  ;;  %v943_v2 = vsub.f32 1.0, %v1712_v62  ;;  %v948_v11 = vmul.f32 %v1712_v62, %v946_v63  ;;  %v1760_v59 = vld [vmem:[#allocation8 + $0x34] ss:$12 sps:$4 sm:$0xff]   ;;  %v1761_v60 = vld [vmem:[#allocation8 + $0x30] ss:$12 sps:$4 sm:$0xff]  }
 0x52c   :  { %v1763_v62 = vld [vmem:[#allocation8 + $0x1c] ss:$12 sps:$4 sm:$0xff]   ;;  %v1764_v63 = vld [vmem:[#allocation8 + $0x18] ss:$12 sps:$4 sm:$0xff]  }
 0x52d   :  { %1713 = vtanh.f32 %v941_v61  ;;  %v1762_v61 = vld [vmem:[#allocation8 + $0x38] ss:$12 sps:$4 sm:$0xff]  }
 0x53a   :  { %v1714_v3 = vpop.eup %1713 }
 0x53b   :  { %v944_v4 = vmul.f32 %v1714_v3, %v943_v2  ;;  %v1765_v2 = vld [vmem:[#allocation8 + $0x20] ss:$12 sps:$4 sm:$0xff]   ;;  %v1766_v3 = vld [vmem:[#allocation8 + $0x4] ss:$12 sps:$4 sm:$0xff]  }
 0x53d   :  { %v2205_v30 = vadd.f32 %v948_v11, %v944_v4  ;;  %v1767_v4 = vld [vmem:[#allocation8] ss:$12 sps:$4 sm:$0xff]  }
 0x53f   :  { %v953_v31 = vpack.c.bf16 %v2205_v30, %v2205_v30  ;;  %v1065_v40 = vrot.slane %v2205_v30, 6 }
 0x541   :  { %987 = vmatmul.mubr.bf16.vlgmr.msra.gmra.mxu0 %v953_v31  ;;  %1574 = vmatmul.mubr.bf16.vlgmr.msra.gmra.mxu1 %v953_v31 }
 0x542   :  { %1077 = vmatpush1.bf16.msra.mxu0 %v1910_v6  ;;  %1578 = vmatpush3.bf16.msra.mxu1 %v1929_v13  ;;  %v1745_v6 = vld [vmem:[#allocation8 + $0xac] ss:$12 sps:$4 sm:$0xff]  }
 0x543   :  { %1078 = vmatprep.subr.bf16.mxu0 %v1912_v7  ;;  %1579 = vmatprep.subr.bf16.mxu1 %v1862_v1 }
 0x544   :  { %1108 = vmatprep.mubr.bf16.mxu0 %v1861_v0  ;;  %1593 = vmatprep.mubr.msk.bf16.mxu1 %vm1863_vm0, %v1862_v1 }
 0x546   :  { %1079 = vmatpush1.bf16.msra.mxu0 %v1917_v8  ;;  %1580 = vmatpush3.bf16.msra.mxu1 %v1940_v16 }
 0x547   :  { %1080 = vmatprep.subr.bf16.mxu0 %v1921_v9  ;;  %1581 = vmatprep.subr.bf16.mxu1 %v1862_v1 }
 0x54a   :  { %1081 = vmatpush1.bf16.msra.mxu0 %v1923_v10  ;;  %1582 = vmatpush3.bf16.msra.mxu1 %v1952_v19  ;;  %v950_v10 = vld [vmem:[#allocation2] sm:$0xc] }
 0x54b   :  { %1082 = vmatprep.subr.bf16.mxu0 %v1927_v12  ;;  %1583 = vmatprep.subr.bf16.mxu1 %v1862_v1 }
 0x54e   :  { %1083 = vmatpush1.bf16.msra.mxu0 %v1933_v14  ;;  %1584 = vmatpush3.bf16.msra.mxu1 %v1962_v22 }
 0x54f   :  { %1084 = vmatprep.subr.bf16.mxu0 %v1936_v15  ;;  %1585 = vmatprep.subr.bf16.mxu1 %v1862_v1 }
 0x552   :  { %1085 = vmatpush1.bf16.msra.mxu0 %v1946_v17  ;;  %1586 = vmatpush3.bf16.msra.mxu1 %v1972_v25 }
 0x553   :  { %1086 = vmatprep.subr.bf16.mxu0 %v1949_v18  ;;  %1587 = vmatprep.subr.bf16.mxu1 %v1862_v1 }
 0x556   :  { %1087 = vmatpush1.bf16.msra.mxu0 %v1956_v20  ;;  %1588 = vmatpush3.bf16.msra.mxu1 %v1980_v27 }
 0x557   :  { %1088 = vmatprep.subr.bf16.mxu0 %v1959_v21  ;;  %1589 = vmatprep.subr.bf16.mxu1 %v1862_v1  ;;  %v951_v21 = vld [vmem:[#allocation2 + $0x18] sm:$0xc] }
 0x55a   :  { %1089 = vmatpush1.bf16.msra.mxu0 %v1966_v23  ;;  %1590 = vmatpush3.bf16.msra.mxu1 %v1986_v28 }
 0x55b   :  { %1090 = vmatprep.subr.bf16.mxu0 %v1969_v24  ;;  %1591 = vmatprep.subr.bf16.mxu1 %v1862_v1 }
 0x55e   :  { %1091 = vmatpush1.bf16.msra.mxu0 %v1976_v26  ;;  %1592 = vmatpush3.bf16.msra.mxu1 %v1994_v29 }
 0x55f   :  { %1198 = vmatprep.subr.bf16.mxu0 %v1745_v6  ;;  %1597 = vmatprep.subr.bf16.mxu1 %v1862_v1  ;;  %v1069_v6 = vld [vmem:[#allocation2] sm:$0x30] }
 0x601   :  { %v988_v7 = vpop.f32.mrf.mxu0  ;;  %v1029_v8 = vpop.f32.mrf.mxu1 }
 0x602   :  { %v1036_v9 = vrot.slane %v988_v7, 6  ;;  %v1055_v27 = vadd.f32 %v2038_v32, %v1029_v8 }
 0x603   :  { %v990_v12 = vpop.f32.mrf.mxu0  ;;  %v1575_v13 = vpop.f32.mrf.mxu1 }
 0x604   :  { %v1038_v14 = vadd.f32 %v1036_v9, %v950_v10  ;;  %v1046_v18 = vrot.slane %v990_v12, 6  ;;  %v1057_v33 = vrot.slane %v1055_v27, 6 }
 0x605   :  { %v992_v15 = vpop.f32.mrf.mxu0  ;;  %v1032_v16 = vpop.f32.mrf.mxu1 }
 0x606   :  { %v1371_v17 = vmul.f32 -1.442695, %v1038_v14  ;;  %v1048_v22 = vadd.f32 %v1046_v18, %v951_v21 }
 0x607   :  { %v993_v19 = vpop.f32.mrf.mxu0  ;;  %v1576_v20 = vpop.f32.mrf.mxu1 }
 0x608   :  { %1715 = vpow2.f32 %v1371_v17  ;;  %v1372_v23 = vmul.f32 -1.442695, %v1048_v22  ;;  %v1070_v17 = vld [vmem:[#allocation2 + $0x18] sm:$0x30] }
 0x60a   :  { %1717 = vpow2.f32 %v1372_v23 }
 0x615   :  { %v1716_v24 = vpop.eup %1715 }
 0x616   :  { %v1042_v25 = vadd.f32 1.0, %v1716_v24 }
 0x617   :  { %v1718_v26 = vpop.eup %1717 }
 0x618   :  { %1719 = vrcp.f32 %v1042_v25  ;;  %v1052_v28 = vadd.f32 1.0, %v1718_v26  ;;  %v1071_v26 = vld [vmem:[#allocation2 + $0x20] sm:$0x30] }
 0x61a   :  { %1721 = vrcp.f32 %v1052_v28 }
 0x625   :  { %v1720_v34 = vpop.eup %1719 }
 0x626   :  { %v1059_v35 = vmul.f32 %v1720_v34, %v1057_v33 }
 0x627   :  { %v1722_v38 = vpop.eup %1721 }
 0x628   :  { %v1060_v37 = vadd.f32 %v1059_v35, %v952_v36  ;;  %v1062_v39 = vsub.f32 1.0, %v1722_v38  ;;  %v1067_v43 = vmul.f32 %v1722_v38, %v1065_v40 }
 0x62a   :  { %1723 = vtanh.f32 %v1060_v37 }
 0x637   :  { %v1724_v42 = vpop.eup %1723 }
 0x638   :  { %v1063_v41 = vmul.f32 %v1724_v42, %v1062_v39 }
 0x63a   :  { %v2245_v44 = vadd.f32 %v1067_v43, %v1063_v41 }
 0x63c   :  { %v1072_v45 = vpack.c.bf16 %v2245_v44, %v2245_v44  ;;  %v1187_v33 = vrot.slane %v2245_v44, 6 }
 0x63e   :  { %v1074_v46 = vrot.slane %v1072_v45, 1  ;;  %v1191_v45 = vld [vmem:[#allocation2] sm:$0xc0] }
 0x640   :  { %1109 = vmatmul.mubr.bf16.vlgmr.msra.gmra.mxu0 %v1074_v46  ;;  %1594 = vmatmul.mubr.bf16.vlgmr.msra.gmra.mxu1 %v1074_v46 }
 0x641   :  { %1199 = vmatpush1.bf16.msra.mxu0 %v1746_v47  ;;  %1598 = vmatpush3.bf16.msra.mxu1 %v1747_v48 }
 0x642   :  { %1200 = vmatprep.subr.bf16.mxu0 %v1748_v49  ;;  %1599 = vmatprep.subr.bf16.mxu1 %v1862_v1 }
 0x643   :  { %1230 = vmatprep.mubr.bf16.mxu0 %v1861_v0  ;;  %1613 = vmatprep.mubr.msk.bf16.mxu1 %vm1863_vm0, %v1862_v1  ;;  %v1755_v0 = vld [vmem:[#allocation8 + $0x60] ss:$12 sps:$4 sm:$0xff]  }
 0x645   :  { %1201 = vmatpush1.bf16.msra.mxu0 %v1749_v50  ;;  %1600 = vmatpush3.bf16.msra.mxu1 %v1750_v51 }
 0x646   :  { %1202 = vmatprep.subr.bf16.mxu0 %v1751_v52  ;;  %1601 = vmatprep.subr.bf16.mxu1 %v1862_v1 }
 0x649   :  { %1203 = vmatpush1.bf16.msra.mxu0 %v1752_v53  ;;  %1602 = vmatpush3.bf16.msra.mxu1 %v1753_v54  ;;  %v1192_v54 = vld [vmem:[#allocation2 + $0x18] sm:$0xc0] }
 0x64a   :  { %1204 = vmatprep.subr.bf16.mxu0 %v1754_v5  ;;  %1603 = vmatprep.subr.bf16.mxu1 %v1862_v1 }
 0x64d   :  { %1205 = vmatpush1.bf16.msra.mxu0 %v1755_v0  ;;  %1604 = vmatpush3.bf16.msra.mxu1 %v1756_v55 }
 0x64e   :  { %1206 = vmatprep.subr.bf16.mxu0 %v1757_v56  ;;  %1605 = vmatprep.subr.bf16.mxu1 %v1862_v1 }
 0x651   :  { %1207 = vmatpush1.bf16.msra.mxu0 %v1758_v57  ;;  %1606 = vmatpush3.bf16.msra.mxu1 %v1759_v58 }
 0x652   :  { %1208 = vmatprep.subr.bf16.mxu0 %v1760_v59  ;;  %1607 = vmatprep.subr.bf16.mxu1 %v1862_v1 }
 0x655   :  { %1209 = vmatpush1.bf16.msra.mxu0 %v1761_v60  ;;  %1608 = vmatpush3.bf16.msra.mxu1 %v1762_v61 }
 0x656   :  { %1210 = vmatprep.subr.bf16.mxu0 %v1763_v62  ;;  %1609 = vmatprep.subr.bf16.mxu1 %v1862_v1 }
 0x659   :  { %1211 = vmatpush1.bf16.msra.mxu0 %v1764_v63  ;;  %1610 = vmatpush3.bf16.msra.mxu1 %v1765_v2  ;;  %v1193_v63 = vld [vmem:[#allocation2 + $0x20] sm:$0xc0] }
 0x65a   :  { %1212 = vmatprep.subr.bf16.mxu0 %v1766_v3  ;;  %1611 = vmatprep.subr.bf16.mxu1 %v1862_v1 }
 0x65d   :  { %1213 = vmatpush1.bf16.msra.mxu0 %v1767_v4  ;;  %1612 = vmatpush3.bf16.msra.mxu1 %v1994_v29 }
 0x700   :  { %v1110_v11 = vpop.f32.mrf.mxu0  ;;  %v1151_v30 = vpop.f32.mrf.mxu1 }
 0x701   :  { %v1158_v31 = vrot.slane %v1110_v11, 4  ;;  %v1177_v21 = vadd.f32 %v2038_v32, %v1151_v30 }
 0x702   :  { %v1112_v7 = vpop.f32.mrf.mxu0  ;;  %v1595_v8 = vpop.f32.mrf.mxu1 }
 0x703   :  { %v1160_v9 = vadd.f32 %v1158_v31, %v1069_v6  ;;  %v1168_v14 = vrot.slane %v1112_v7, 4  ;;  %v1179_v23 = vrot.slane %v1177_v21, 4 }
 0x704   :  { %v1114_v10 = vpop.f32.mrf.mxu0  ;;  %v1154_v12 = vpop.f32.mrf.mxu1 }
 0x705   :  { %v1373_v13 = vmul.f32 -1.442695, %v1160_v9  ;;  %v1170_v1 = vadd.f32 %v1168_v14, %v1070_v17 }
 0x706   :  { %v1115_v15 = vpop.f32.mrf.mxu0  ;;  %v1596_v16 = vpop.f32.mrf.mxu1 }
 0x707   :  { %1725 = vpow2.f32 %v1373_v13  ;;  %v1374_v18 = vmul.f32 -1.442695, %v1170_v1 }
 0x709   :  { %1727 = vpow2.f32 %v1374_v18 }
 0x714   :  { %v1726_v19 = vpop.eup %1725 }
 0x715   :  { %v1164_v29 = vadd.f32 1.0, %v1726_v19 }
 0x716   :  { %v1728_v20 = vpop.eup %1727 }
 0x717   :  { %1729 = vrcp.f32 %v1164_v29  ;;  %v1174_v22 = vadd.f32 1.0, %v1728_v20 }
 0x719   :  { %1731 = vrcp.f32 %v1174_v22 }
 0x724   :  { %v1730_v24 = vpop.eup %1729 }
 0x725   :  { %v1181_v25 = vmul.f32 %v1730_v24, %v1179_v23 }
 0x726   :  { %v1732_v28 = vpop.eup %1731 }
 0x727   :  { %v1182_v27 = vadd.f32 %v1181_v25, %v1071_v26  ;;  %v1184_v34 = vsub.f32 1.0, %v1732_v28  ;;  %v1189_v37 = vmul.f32 %v1732_v28, %v1187_v33 }
 0x729   :  { %1733 = vtanh.f32 %v1182_v27 }
 0x736   :  { %v1734_v35 = vpop.eup %1733 }
 0x737   :  { %v1185_v36 = vmul.f32 %v1734_v35, %v1184_v34 }
 0x739   :  { %v1190_v38 = vadd.f32 %v1189_v37, %v1185_v36 }
 0x73b   :  { %v1194_v40 = vpack.c.bf16 %v1190_v38, %v1190_v38  ;;  %v1309_v11 = vrot.slane %v1190_v38, 6 }
 0x73d   :  { %v1196_v39 = vrot.slane %v1194_v40, 2 }
 0x73f   :  { %1231 = vmatmul.mubr.bf16.vlgmr.msra.gmra.mxu0 %v1196_v39  ;;  %1614 = vmatmul.mubr.bf16.vlgmr.msra.gmra.mxu1 %v1196_v39 }
 0x7ff   :  { %v1232_v42 = vpop.f32.mrf.mxu0  ;;  %v1273_v41 = vpop.f32.mrf.mxu1 }
 0x800   :  { %v1280_v43 = vrot.slane %v1232_v42, 2  ;;  %v1299_v58 = vadd.f32 %v2038_v32, %v1273_v41 }
 0x801   :  { %v1234_v46 = vpop.f32.mrf.mxu0  ;;  %v1615_v47 = vpop.f32.mrf.mxu1 }
 0x802   :  { %v1282_v48 = vadd.f32 %v1280_v43, %v1191_v45  ;;  %v1290_v44 = vrot.slane %v1234_v46, 2  ;;  %v1301_v60 = vrot.slane %v1299_v58, 2 }
 0x803   :  { %v1236_v49 = vpop.f32.mrf.mxu0  ;;  %v1276_v50 = vpop.f32.mrf.mxu1 }
 0x804   :  { %v1375_v51 = vmul.f32 -1.442695, %v1282_v48  ;;  %v1292_v5 = vadd.f32 %v1290_v44, %v1192_v54 }
 0x805   :  { %v1237_v52 = vpop.f32.mrf.mxu0  ;;  %v1616_v53 = vpop.f32.mrf.mxu1 }
 0x806   :  { %1735 = vpow2.f32 %v1375_v51  ;;  %v1376_v0 = vmul.f32 -1.442695, %v1292_v5 }
 0x808   :  { %1737 = vpow2.f32 %v1376_v0 }
 0x813   :  { %v1736_v55 = vpop.eup %1735 }
 0x814   :  { %v1286_v56 = vadd.f32 1.0, %v1736_v55 }
 0x815   :  { %v1738_v57 = vpop.eup %1737 }
 0x816   :  { %1739 = vrcp.f32 %v1286_v56  ;;  %v1296_v59 = vadd.f32 1.0, %v1738_v57 }
 0x818   :  { %1741 = vrcp.f32 %v1296_v59 }
 0x823   :  { %v1740_v61 = vpop.eup %1739 }
 0x824   :  { %v1303_v62 = vmul.f32 %v1740_v61, %v1301_v60 }
 0x825   :  { %v1742_v3 = vpop.eup %1741 }
 0x826   :  { %v1304_v2 = vadd.f32 %v1303_v62, %v1193_v63  ;;  %v1306_v4 = vsub.f32 1.0, %v1742_v3  ;;  %v1311_v6 = vmul.f32 %v1742_v3, %v1309_v11 }
 0x828   :  { %1743 = vtanh.f32 %v1304_v2 }
 0x835   :  { %v1744_v30 = vpop.eup %1743 }
 0x836   :  { %v1307_v31 = vmul.f32 %v1744_v30, %v1306_v4 }
 0x838   :  { %v1312_v7 = vadd.f32 %v1311_v6, %v1307_v31 }
 0x83a   :  { %1313 = vst [vmem:[#allocation9 - $0x6] sm:$0xc0] %v1312_v7 }
 0x83b   :  { %1839 = shalt.err (!%p1836_p5)
}
 0x83c   :  { %1323 = dma.vmem_to_hbm [thread:$0]  %s1321_s12, 32, %s2271_s5, [#allocation5]  }
 0x83d   :  { %1852 = dma.done.wait [#allocation5], 32  }
 0x83e   :  { %1853 = vsyncadd [#allocation5], 4294967264 }
 0x83f   :  { %1327 = vsyncpa [#allocation4], 1 }
 0x840   :  { %1328 = vsyncpa [#allocation7], 1 }
 0x841   :  { %1329 = vsyncpa [#allocation5], 1 }

</bundles_post_ra>
